<compile_context>
chip_gen: v7x
topology: tpu7x:2x2x1
jax: 0.10.0
libtpu: 0.0.40
codegen_flags: <defaults>
</compile_context>

<pallas_src>
import functools
import re

import jax
import jax.numpy as jnp
from jax.experimental import pallas as pl
from jax.experimental.pallas import tpu as pltpu


# ---------------------------------------------------------------------------
# Kernel
# ---------------------------------------------------------------------------
def ff_kernel(x_ref, w1s_ref, b1s_ref, w2_ref, b2_ref, w3_ref, b3_ref, o_ref):
    """Fused FF forward on one row-tile of the lane-packed input.

    x_ref   : [T, P*in]        f32   (cast to bf16 in-kernel; no wrapper pass)
    w1s_ref : [P*in, 2*P*out]  bf16  (block-diag W1 | block-diag Ws, fused)
    b1s_ref : [1, 2*P*out]     f32   (tiled b1 | tiled bs)
    w2_ref  : [P*out, P*out]   bf16  (block-diag W2)
    w3_ref  : [P*out, P*out]   bf16  (block-diag W3)
    o_ref   : [T, P*out]       f32 or bf16
    """
    x = x_ref[...].astype(jnp.bfloat16)
    pout = w2_ref.shape[0]

    # Layer 1 + shortcut: one MXU pass over x, f32 accumulation.
    h_sc = jnp.dot(x, w1s_ref[...], preferred_element_type=jnp.float32)
    h_sc = h_sc + b1s_ref[...]
    h = jnp.maximum(h_sc[:, :pout], 0.0)              # relu(x @ W1 + b1)
    sc = h_sc[:, pout:]                               # x @ Ws + bs

    # Layer 2.
    h = jnp.dot(h.astype(jnp.bfloat16), w2_ref[...],
                preferred_element_type=jnp.float32) + b2_ref[...]
    h = jnp.maximum(h, 0.0)

    # Layer 3 (no ReLU inside the GINMLP block's last layer).
    blk = jnp.dot(h.astype(jnp.bfloat16), w3_ref[...],
                  preferred_element_type=jnp.float32) + b3_ref[...]

    # FF.forward: relu(block(x)) + shortcut(x)
    o_ref[...] = (jnp.maximum(blk, 0.0) + sc).astype(o_ref.dtype)


# ---------------------------------------------------------------------------
# Helpers
# ---------------------------------------------------------------------------
def _cdiv(a, b):
    return -(-a // b)


def _round_up(a, b):
    return _cdiv(a, b) * b


def tpu_generation():
    """Best-effort TPU generation from device_kind (e.g. 'TPU v6 lite' -> 6)."""
    try:
        kind = jax.devices()[0].device_kind
        m = re.search(r"(\d+)", kind)
        return int(m.group(1)) if m else 0
    except Exception:
        return 0


def default_pack(in_feats, out_feats):
    """Lane packing per generation: 256-lane on v6e/v7x (2x256x256 MXU),
    128-lane on v5e/older (128x128 MXU fills at K=N=128)."""
    pack = 8 if tpu_generation() >= 6 else 4
    # Keep lane widths multiples of 128 for unmasked vst / aligned slices.
    tries = 0
    while ((pack * in_feats) % 128 or (pack * out_feats) % 128) and tries < 8:
        pack *= 2
        tries += 1
    return pack


def pack_params(params, pack):
    """Repack [fan_in, fan_out] f32 weights into lane-dense block-diagonal bf16.

    block_diag(W, ..., W) (pack copies) == kron(I_pack, W).  Done once, outside
    the per-call jitted path.
    """
    def bd(w):
        return jnp.kron(jnp.eye(pack, dtype=w.dtype), w).astype(jnp.bfloat16)

    def tb(b):
        return jnp.tile(b.astype(jnp.float32), (1, pack))

    w1s = jnp.concatenate([bd(params["w1"]), bd(params["ws"])], axis=1)
    b1s = jnp.concatenate([tb(params["b1"]), tb(params["bs"])], axis=1)
    return dict(
        w1s=w1s, b1s=b1s,
        w2=bd(params["w2"]), b2=tb(params["b2"]),
        w3=bd(params["w3"]), b3=tb(params["b3"]),
    )


# ---------------------------------------------------------------------------
# Wrapper
# ---------------------------------------------------------------------------
@functools.partial(jax.jit, static_argnames=("pack", "out_dtype", "max_tile_rows"))
def ff_forward(x, packed, pack=4, out_dtype=jnp.float32, max_tile_rows=2048):
    """x: [N, in_feats] f32.  packed: output of pack_params(params, pack)."""
    n, in_feats = x.shape
    pin = pack * in_feats
    pout = packed["w2"].shape[0]
    out_feats = pout // pack

    # Tile selection: aim for an even grid >= 2 (keeps both v7x TensorCores
    # busy under dimension_semantics=("parallel",)) with the largest tile
    # <= max_tile_rows, and never pad more than ~one tile of rows.
    rows = _cdiv(n, pack)
    target_grid = max(2, _cdiv(rows, max_tile_rows))
    if target_grid % 2:
        target_grid += 1
    t = max(8, _round_up(_cdiv(rows, target_grid), 8))
    grid = _cdiv(rows, t)
    rows_pad = grid * t
    n_pad = rows_pad * pack

    if n_pad != n:
        x = jnp.pad(x, ((0, n_pad - n), (0, 0)))
    # Lane-dense view: [n_pad, in] -> [rows_pad, pack*in].  Free row-major
    # reshape; dtype stays f32 so the wrapper never does a separate cast pass
    # over HBM -- the bf16 cast happens inside the kernel.
    xp = x.reshape(rows_pad, pin)

    out_itemsize = jnp.dtype(out_dtype).itemsize
    # VMEM estimate: double-buffered x/out tiles + double-buffered weights and
    # biases + in-kernel temporaries (x bf16 cast, h_sc, h, bf16 casts, blk,
    # relu+add result).
    vmem_est = (
        2 * (t * pin * 4 + t * pout * out_itemsize)
        + 2 * 2 * (packed["w1s"].size + packed["w2"].size + packed["w3"].size)
        + 2 * 4 * (packed["b1s"].size + packed["b2"].size + packed["b3"].size)
        + t * pin * 2                       # x bf16 cast
        + t * (2 * pout) * 4                # h_sc
        + t * pout * (4 + 2 + 2 + 4 + 4)    # h f32, two bf16 casts, blk, out
        + (2 << 20)                         # headroom
    )
    # Override only when we would exceed the most conservative scoped default
    # (v5e: 16 MiB); the estimate stays well under v7x's 64 MiB physical VMEM.
    vmem_limit = int(vmem_est) if vmem_est > (14 << 20) else None

    full = lambda arr: pl.BlockSpec(arr.shape, lambda i: (0, 0))

    out_p = pl.pallas_call(
        ff_kernel,
        out_shape=jax.ShapeDtypeStruct((rows_pad, pout), out_dtype),
        grid_spec=pltpu.PrefetchScalarGridSpec(
            num_scalar_prefetch=0,
            grid=(grid,),
            in_specs=[
                pl.BlockSpec((t, pin), lambda i: (i, 0)),    # x tile (lane-dense, f32)
                full(packed["w1s"]), full(packed["b1s"]),    # fused W1|Ws, b1|bs
                full(packed["w2"]), full(packed["b2"]),
                full(packed["w3"]), full(packed["b3"]),
            ],
            out_specs=pl.BlockSpec((t, pout), lambda i: (i, 0)),
        ),
        compiler_params=pltpu.CompilerParams(
            dimension_semantics=("parallel",),
            vmem_limit_bytes=vmem_limit),
    )(xp, packed["w1s"], packed["b1s"], packed["w2"], packed["b2"],
      packed["w3"], packed["b3"])

    # Unpack: [rows_pad, pack*out] -> [N, out].
    return out_p.reshape(rows_pad * pack, out_feats)[:n]


# ---------------------------------------------------------------------------
# Params / reference
# ---------------------------------------------------------------------------
def init_params(key, in_feats, out_feats):
    """nn.Linear-style init; weights stored pre-transposed as [fan_in, fan_out]."""
    def linear(k, fan_in, fan_out):
        kw, kb = jax.random.split(k)
        bound = 1.0 / (fan_in ** 0.5)
        w = jax.random.uniform(kw, (fan_in, fan_out), jnp.float32, -bound, bound)
        b = jax.random.uniform(kb, (1, fan_out), jnp.float32, -bound, bound)
        return w, b

    k1, k2, k3, ks = jax.random.split(key, 4)
    w1, b1 = linear(k1, in_feats, out_feats)
    w2, b2 = linear(k2, out_feats, out_feats)
    w3, b3 = linear(k3, out_feats, out_feats)
    ws, bs = linear(ks, in_feats, out_feats)
    return dict(w1=w1, b1=b1, w2=w2, b2=b2, w3=w3, b3=b3, ws=ws, bs=bs)


def ff_reference(x, p):
    """Pure-JAX reference mirroring the kernel's bf16-input / f32-accumulate math."""
    hp = jax.lax.Precision.HIGHEST
    bf = lambda a: a.astype(jnp.bfloat16).astype(jnp.float32)
    xb = bf(x)
    h = jax.nn.relu(jnp.dot(xb, bf(p["w1"]), precision=hp) + p["b1"])
    sc = jnp.dot(xb, bf(p["ws"]), precision=hp) + p["bs"]
    h = jax.nn.relu(jnp.dot(bf(h), bf(p["w2"]), precision=hp) + p["b2"])
    blk = jnp.dot(bf(h), bf(p["w3"]), precision=hp) + p["b3"]
    return jax.nn.relu(blk) + sc


if __name__ == "__main__":
    in_feats, out_feats = 32, 32
    n = 4096        # rows; pack=4 -> 1024 packed rows, pack=8 -> 512; grid = 2

    pack = default_pack(in_feats, out_feats)   # 8 on v6e/v7x, 4 on v5e/older

    key = jax.random.PRNGKey(0)
    kx, kp = jax.random.split(key)
    x = jax.random.normal(kx, (n, in_feats), jnp.float32)
    params = init_params(kp, in_feats, out_feats)
    packed = pack_params(params, pack)

    ref = ff_reference(x, params)

    # f32-output path (closest to the PyTorch f32 result).
    out = jax.block_until_ready(ff_forward(x, packed, pack=pack))
    assert out.shape == (n, out_feats)
    assert jnp.allclose(out, ref, atol=1e-2, rtol=1e-2), "f32 output mismatch vs reference"

    # bf16-output path (halves output HBM bytes; slightly looser numerics).
    out_bf = jax.block_until_ready(
        ff_forward(x, packed, pack=pack, out_dtype=jnp.bfloat16))
    assert out_bf.dtype == jnp.bfloat16
    assert jnp.allclose(out_bf.astype(jnp.float32), ref, atol=5e-2, rtol=5e-2), \
        "bf16 output mismatch vs reference"

    print("KERNEL_OK")
</pallas_src>

<mosaic_0001>
module attributes {stable_mosaic.version = 11 : i64} {
  func.func @ff_kernel(%arg0: i32, %arg1: memref<512x128xf32, #tpu.memory_space<vmem>>, %arg2: memref<128x256xbf16, #tpu.memory_space<vmem>>, %arg3: memref<1x256xf32, #tpu.memory_space<vmem>>, %arg4: memref<128x128xbf16, #tpu.memory_space<vmem>>, %arg5: memref<1x128xf32, #tpu.memory_space<vmem>>, %arg6: memref<128x128xbf16, #tpu.memory_space<vmem>>, %arg7: memref<1x128xf32, #tpu.memory_space<vmem>>, %arg8: memref<512x128xf32, #tpu.memory_space<vmem>>) attributes {dimension_semantics = [#tpu.dimension_semantics<parallel>], iteration_bounds = array<i64: 2>, scalar_prefetch = 0 : i64, scratch_operands = 0 : i64, tpu.core_type = #tpu.core_type<tc>, window_params = [{transform_indices = @transform_0, window_bounds = array<i64: 512, 128>}, {pipeline_mode = #tpu.pipeline_mode<synchronous>, transform_indices = @transform_1, window_bounds = array<i64: 128, 256>}, {pipeline_mode = #tpu.pipeline_mode<synchronous>, transform_indices = @transform_2, window_bounds = array<i64: 1, 256>}, {pipeline_mode = #tpu.pipeline_mode<synchronous>, transform_indices = @transform_3, window_bounds = array<i64: 128, 128>}, {pipeline_mode = #tpu.pipeline_mode<synchronous>, transform_indices = @transform_4, window_bounds = array<i64: 1, 128>}, {pipeline_mode = #tpu.pipeline_mode<synchronous>, transform_indices = @transform_5, window_bounds = array<i64: 128, 128>}, {pipeline_mode = #tpu.pipeline_mode<synchronous>, transform_indices = @transform_6, window_bounds = array<i64: 1, 128>}, {transform_indices = @transform_7, window_bounds = array<i64: 512, 128>}]} {
    %c0 = arith.constant 0 : index
    %c0_0 = arith.constant 0 : index
    %0 = vector.load %arg1[%c0, %c0_0] : memref<512x128xf32, #tpu.memory_space<vmem>>, vector<512x128xf32>
    %1 = arith.truncf %0 : vector<512x128xf32> to vector<512x128xbf16>
    %c0_1 = arith.constant 0 : index
    %c0_2 = arith.constant 0 : index
    %2 = vector.load %arg2[%c0_1, %c0_2] : memref<128x256xbf16, #tpu.memory_space<vmem>>, vector<128x256xbf16>
    %cst = arith.constant dense<0.000000e+00> : vector<512x256xf32>
    %3 = tpu.matmul %1, %2, %cst {dimension_numbers = #tpu.dot_dimension_numbers<[1], [0], [0], [1], [0, 0, 1, 1], [], []>} : vector<512x128xbf16>, vector<128x256xbf16>, vector<512x256xf32> -> vector<512x256xf32>
    %c0_3 = arith.constant 0 : index
    %c0_4 = arith.constant 0 : index
    %4 = vector.load %arg3[%c0_3, %c0_4] : memref<1x256xf32, #tpu.memory_space<vmem>>, vector<1x256xf32>
    %5 = vector.broadcast %4 : vector<1x256xf32> to vector<512x256xf32>
    %6 = arith.addf %3, %5 : vector<512x256xf32>
    %7 = vector.extract_strided_slice %6 {offsets = [0, 0], sizes = [512, 128], strides = [1, 1]} : vector<512x256xf32> to vector<512x128xf32>
    %cst_5 = arith.constant 0.000000e+00 : f32
    %8 = vector.broadcast %cst_5 : f32 to vector<512x128xf32>
    %9 = arith.maximumf %7, %8 : vector<512x128xf32>
    %10 = vector.extract_strided_slice %6 {offsets = [0, 128], sizes = [512, 128], strides = [1, 1]} : vector<512x256xf32> to vector<512x128xf32>
    %11 = arith.truncf %9 : vector<512x128xf32> to vector<512x128xbf16>
    %c0_6 = arith.constant 0 : index
    %c0_7 = arith.constant 0 : index
    %12 = vector.load %arg4[%c0_6, %c0_7] : memref<128x128xbf16, #tpu.memory_space<vmem>>, vector<128x128xbf16>
    %cst_8 = arith.constant dense<0.000000e+00> : vector<512x128xf32>
    %13 = tpu.matmul %11, %12, %cst_8 {dimension_numbers = #tpu.dot_dimension_numbers<[1], [0], [0], [1], [0, 0, 1, 1], [], []>} : vector<512x128xbf16>, vector<128x128xbf16>, vector<512x128xf32> -> vector<512x128xf32>
    %c0_9 = arith.constant 0 : index
    %c0_10 = arith.constant 0 : index
    %14 = vector.load %arg5[%c0_9, %c0_10] : memref<1x128xf32, #tpu.memory_space<vmem>>, vector<1x128xf32>
    %15 = vector.broadcast %14 : vector<1x128xf32> to vector<512x128xf32>
    %16 = arith.addf %13, %15 : vector<512x128xf32>
    %cst_11 = arith.constant 0.000000e+00 : f32
    %17 = vector.broadcast %cst_11 : f32 to vector<512x128xf32>
    %18 = arith.maximumf %16, %17 : vector<512x128xf32>
    %19 = arith.truncf %18 : vector<512x128xf32> to vector<512x128xbf16>
    %c0_12 = arith.constant 0 : index
    %c0_13 = arith.constant 0 : index
    %20 = vector.load %arg6[%c0_12, %c0_13] : memref<128x128xbf16, #tpu.memory_space<vmem>>, vector<128x128xbf16>
    %cst_14 = arith.constant dense<0.000000e+00> : vector<512x128xf32>
    %21 = tpu.matmul %19, %20, %cst_14 {dimension_numbers = #tpu.dot_dimension_numbers<[1], [0], [0], [1], [0, 0, 1, 1], [], []>} : vector<512x128xbf16>, vector<128x128xbf16>, vector<512x128xf32> -> vector<512x128xf32>
    %c0_15 = arith.constant 0 : index
    %c0_16 = arith.constant 0 : index
    %22 = vector.load %arg7[%c0_15, %c0_16] : memref<1x128xf32, #tpu.memory_space<vmem>>, vector<1x128xf32>
    %23 = vector.broadcast %22 : vector<1x128xf32> to vector<512x128xf32>
    %24 = arith.addf %21, %23 : vector<512x128xf32>
    %cst_17 = arith.constant 0.000000e+00 : f32
    %25 = vector.broadcast %cst_17 : f32 to vector<512x128xf32>
    %26 = arith.maximumf %24, %25 : vector<512x128xf32>
    %27 = arith.addf %26, %10 : vector<512x128xf32>
    %c0_18 = arith.constant 0 : index
    %c0_19 = arith.constant 0 : index
    %28 = vector.load %arg8[%c0_18, %c0_19] : memref<512x128xf32, #tpu.memory_space<vmem>>, vector<512x128xf32>
    tpu.vector_store %arg8[%c0_18, %c0_19], %27 {strides = array<i32>} : memref<512x128xf32, #tpu.memory_space<vmem>>, vector<512x128xf32>,
    return
  }
  func.func @transform_0(%arg0: i32) -> (i32, i32) {
    %c0_i32 = arith.constant 0 : i32
    %c0_i32_0 = arith.constant 0 : i32
    return %arg0, %c0_i32 : i32, i32
  }
  func.func @transform_1(%arg0: i32) -> (i32, i32) {
    %c0_i32 = arith.constant 0 : i32
    %c0_i32_0 = arith.constant 0 : i32
    %c0_i32_1 = arith.constant 0 : i32
    return %c0_i32, %c0_i32_0 : i32, i32
  }
  func.func @transform_2(%arg0: i32) -> (i32, i32) {
    %c0_i32 = arith.constant 0 : i32
    %c0_i32_0 = arith.constant 0 : i32
    %c0_i32_1 = arith.constant 0 : i32
    return %c0_i32, %c0_i32_0 : i32, i32
  }
  func.func @transform_3(%arg0: i32) -> (i32, i32) {
    %c0_i32 = arith.constant 0 : i32
    %c0_i32_0 = arith.constant 0 : i32
    %c0_i32_1 = arith.constant 0 : i32
    return %c0_i32, %c0_i32_0 : i32, i32
  }
  func.func @transform_4(%arg0: i32) -> (i32, i32) {
    %c0_i32 = arith.constant 0 : i32
    %c0_i32_0 = arith.constant 0 : i32
    %c0_i32_1 = arith.constant 0 : i32
    return %c0_i32, %c0_i32_0 : i32, i32
  }
  func.func @transform_5(%arg0: i32) -> (i32, i32) {
    %c0_i32 = arith.constant 0 : i32
    %c0_i32_0 = arith.constant 0 : i32
    %c0_i32_1 = arith.constant 0 : i32
    return %c0_i32, %c0_i32_0 : i32, i32
  }
  func.func @transform_6(%arg0: i32) -> (i32, i32) {
    %c0_i32 = arith.constant 0 : i32
    %c0_i32_0 = arith.constant 0 : i32
    %c0_i32_1 = arith.constant 0 : i32
    return %c0_i32, %c0_i32_0 : i32, i32
  }
  func.func @transform_7(%arg0: i32) -> (i32, i32) {
    %c0_i32 = arith.constant 0 : i32
    %c0_i32_0 = arith.constant 0 : i32
    return %arg0, %c0_i32 : i32, i32
  }
}

</mosaic_0001>

<bundles_post_ra>
// kernel: ff_forward.1
= control target key start
LH: loop header
LB: loop body
LE: loop exit
PB: predicated region body
PF: predicated region fallthrough
CT: control target
= control target key end

     0   :  { %s2383_s24 = smov 0   ;;  %s3140_s0 = inlined_call_operand.vmem [shape: f32[1024,128], index: 0, kind: input, shape index: {}]   ;;  %s3141_s1 = inlined_call_operand.vmem [shape: bf16[128,256], index: 1, kind: input, shape index: {}]   ;;  %s3142_s2 = inlined_call_operand.vmem [shape: f32[1,256], index: 2, kind: input, shape index: {}]   ;;  %s3143_s3 = inlined_call_operand.vmem [shape: bf16[128,128], index: 3, kind: input, shape index: {}]   ;;  %s3144_s4 = inlined_call_operand.vmem [shape: f32[1,128], index: 4, kind: input, shape index: {}]   ;;  %s3145_s5 = inlined_call_operand.vmem [shape: bf16[128,128], index: 5, kind: input, shape index: {}]   ;;  %s3146_s6 = inlined_call_operand.vmem [shape: f32[1,128], index: 6, kind: input, shape index: {}]   ;;  %s3147_s7 = inlined_call_operand.vmem [shape: f32[1024,128], index: 7, kind: output, shape index: {}]  }
   0x1 LB: > { %s2000_s25 = sadd.s32 4294967295, %s2340_s24   ;;  %p2004_p0 = scmp.ge.s32.totalorder %s2340_s24, 1  ;;  %s2340_s24 = sphi %s2383_s24, %s17_s24  }
   0x2   : > { %p238_p1 = scmp.lt.s32.totalorder %s2340_s24, 3 }
   0x4   : > { %p239_p2 = pnand %p2004_p0, %p238_p1 }
   0x6   : > { %242 = sbr.rel (%p239_p2) target bundleno = 958 (0x3be), region = 48 }
   0xd   : > { %v2294_v0 = vld [vmem:[%s3141_s1 + $0x4] ss:$8 sps:$4 sm:$0xff]   ;;  %v2296_v1 = vld [vmem:[%s3141_s1] ss:$8 sps:$4 sm:$0xff]   ;;  %v2342_v2 = vmov 0   ;;  %s2005_s17 = sshll.u32 %s2000_s25, 6  ;;  %v397_v53 = vlaneseq }
   0xe   : > { %519 = vmatprep.mubr.bf16.mxu0 %v2342_v2  ;;  %487 = vmatprep.subr.bf16.mxu0 %v2294_v0  ;;  %v2297_v3 = vld [vmem:[%s3141_s1 + $0x14] ss:$8 sps:$4 sm:$0xff]   ;;  %v2299_v4 = vld [vmem:[%s3141_s1 + $0x10] ss:$8 sps:$4 sm:$0xff]   ;;  %v2300_v5 = vld [vmem:[%s3141_s1 + $0x24] ss:$8 sps:$4 sm:$0xff]  }
   0xf   : > { %488 = vmatpush1.bf16.msra.mxu0 %v2296_v1  ;;  %v2302_v6 = vld [vmem:[%s3141_s1 + $0x20] ss:$8 sps:$4 sm:$0xff]   ;;  %v2303_v7 = vld [vmem:[%s3141_s1 + $0x34] ss:$8 sps:$4 sm:$0xff]   ;;  %v2305_v8 = vld [vmem:[%s3141_s1 + $0x30] ss:$8 sps:$4 sm:$0xff]  }
  0x10   : > { %489 = vmatprep.subr.bf16.mxu0 %v2297_v3  ;;  %v2306_v9 = vld [vmem:[%s3141_s1 + $0x44] ss:$8 sps:$4 sm:$0xff]   ;;  %p271_p3 = scmp.lt.s32.totalorder %s2005_s17, 127  ;;  %v2308_v10 = vld [vmem:[%s3141_s1 + $0x40] ss:$8 sps:$4 sm:$0xff]   ;;  %v2320_v49 = vld [vmem:[%s3143_s3 + $0x10] sm:$0xff]  }
  0x11   : > { %v2309_v11 = vld [vmem:[%s3141_s1 + $0x54] ss:$8 sps:$4 sm:$0xff]   ;;  %v2311_v12 = vld [vmem:[%s3141_s1 + $0x50] ss:$8 sps:$4 sm:$0xff]   ;;  %v2312_v13 = vld [vmem:[%s3141_s1 + $0x64] ss:$8 sps:$4 sm:$0xff]  }
  0x12   : > { %s3195_s17 = smov (!%p271_p3, %s2005_s17), 127  ;;  %v2314_v14 = vld [vmem:[%s3141_s1 + $0x60] ss:$8 sps:$4 sm:$0xff]   ;;  %v2315_v15 = vld [vmem:[%s3141_s1 + $0x74] ss:$8 sps:$4 sm:$0xff]   ;;  %v2494_v55 = vshrl.u32 %v397_v53, 7 }
  0x13   : > { %490 = vmatpush1.bf16.msra.mxu0 %v2299_v4  ;;  %s2006_s8 = sshll.u32 %s3195_s17, 3  ;;  %v2317_v16 = vld [vmem:[%s3141_s1 + $0x70] ss:$8 sps:$4 sm:$0xff]   ;;  %v2318_v44 = vld [vmem:[%s3143_s3] sm:$0xff]   ;;  %v2319_v48 = vld [vmem:[%s3143_s3 + $0x8] sm:$0xff]  }
  0x14   : > { %491 = vmatprep.subr.bf16.mxu0 %v2300_v5  ;;  %s2445_s15 = scalar_lea.vmem %s3140_s0, %s2006_s8  ;;  %2125 = vmatprep.subr.bf16.mxu1 %v2318_v44  ;;  %v2321_v54 = vld [vmem:[%s3143_s3 + $0x18] sm:$0xff]   ;;  %v2499_v56 = vld [vmem:[%s3142_s2] sm:$0x3]  ;;  %v403_v59 = vsub.s32 1, %v2494_v55  ;;  %v2323_v63 = vld [vmem:[%s3143_s3 + $0x28] sm:$0xff]   ;;  %s2886_s19 = scalar_lea.vmem %s3147_s7, %s2006_s8 }
  0x15   : > { %v283_v17 = vld [vmem:[%s2445_s15] sm:$0xff]  ;;  %v284_v18 = vld [vmem:[%s2445_s15 + $0x8] sm:$0xff]  ;;  %v285_v20 = vld [vmem:[%s2445_s15 + $0x10] sm:$0xff]  ;;  %2126 = vmatpush3.bf16.msra.mxu1 %v2318_v44 }
  0x16   : > { %v347_v19 = vpack.c.bf16 %v284_v18, %v283_v17  ;;  %v286_v21 = vld [vmem:[%s2445_s15 + $0x18] sm:$0xff]  ;;  %v287_v23 = vld [vmem:[%s2445_s15 + $0x20] sm:$0xff]  ;;  %v288_v24 = vld [vmem:[%s2445_s15 + $0x28] sm:$0xff]  ;;  %2127 = vmatprep.subr.bf16.mxu1 %v2319_v48  ;;  %v2509_v61 = vrot.slane %v2499_v56, %v403_v59 }
  0x17   : > { %492 = vmatpush1.bf16.msra.mxu0 %v2302_v6  ;;  %v348_v22 = vpack.c.bf16 %v286_v21, %v285_v20  ;;  %v349_v25 = vpack.c.bf16 %v288_v24, %v287_v23  ;;  %v289_v26 = vld [vmem:[%s2445_s15 + $0x30] sm:$0xff]  ;;  %v290_v27 = vld [vmem:[%s2445_s15 + $0x38] sm:$0xff]  ;;  %v291_v29 = vld [vmem:[%s2445_s15 + $0x40] sm:$0xff] }
  0x18   : > { %493 = vmatprep.subr.bf16.mxu0 %v2303_v7  ;;  %v350_v28 = vpack.c.bf16 %v290_v27, %v289_v26  ;;  %v292_v30 = vld [vmem:[%s2445_s15 + $0x48] sm:$0xff]  ;;  %v293_v32 = vld [vmem:[%s2445_s15 + $0x50] sm:$0xff]  ;;  %v294_v33 = vld [vmem:[%s2445_s15 + $0x58] sm:$0xff] }
  0x19   : > { %v351_v31 = vpack.c.bf16 %v292_v30, %v291_v29  ;;  %v352_v34 = vpack.c.bf16 %v294_v33, %v293_v32  ;;  %v295_v35 = vld [vmem:[%s2445_s15 + $0x60] sm:$0xff]  ;;  %v296_v36 = vld [vmem:[%s2445_s15 + $0x68] sm:$0xff]  ;;  %v297_v38 = vld [vmem:[%s2445_s15 + $0x70] sm:$0xff]  ;;  %2128 = vmatpush3.bf16.msra.mxu1 %v2319_v48  ;;  %v399_v48 = vsub.s32 0, %v2494_v55 }
  0x1a   : > { %v353_v37 = vpack.c.bf16 %v296_v36, %v295_v35  ;;  %v298_v39 = vld [vmem:[%s2445_s15 + $0x78] sm:$0xff]  ;;  %v299_v41 = vld [vmem:[%s2445_s15 + $0x80] sm:$0xff]  ;;  %v300_v42 = vld [vmem:[%s2445_s15 + $0x88] sm:$0xff]  ;;  %2129 = vmatprep.subr.bf16.mxu1 %v2320_v49 }
  0x1b   : > { %494 = vmatpush1.bf16.msra.mxu0 %v2305_v8  ;;  %v354_v40 = vpack.c.bf16 %v298_v39, %v297_v38  ;;  %v355_v43 = vpack.c.bf16 %v300_v42, %v299_v41  ;;  %v301_v45 = vld [vmem:[%s2445_s15 + $0x90] sm:$0xff]  ;;  %v302_v46 = vld [vmem:[%s2445_s15 + $0x98] sm:$0xff]  ;;  %v303_v50 = vld [vmem:[%s2445_s15 + $0xa0] sm:$0xff] }
  0x1c   : > { %495 = vmatprep.subr.bf16.mxu0 %v2306_v9  ;;  %v356_v47 = vpack.c.bf16 %v302_v46, %v301_v45  ;;  %v304_v51 = vld [vmem:[%s2445_s15 + $0xa8] sm:$0xff]  ;;  %v305_v57 = vld [vmem:[%s2445_s15 + $0xb0] sm:$0xff]  ;;  %v306_v58 = vld [vmem:[%s2445_s15 + $0xb8] sm:$0xff] }
  0x1d   : > { %v357_v52 = vpack.c.bf16 %v304_v51, %v303_v50  ;;  %2130 = vmatpush3.bf16.msra.mxu1 %v2320_v49  ;;  %v2322_v60 = vld [vmem:[%s3143_s3 + $0x20] sm:$0xff]   ;;  %v358_v62 = vpack.c.bf16 %v306_v58, %v305_v57  ;;  %v308_v1 = vld [vmem:[%s2445_s15 + $0xc8] sm:$0xff]  ;;  %v2324_v3 = vld [vmem:[%s3143_s3 + $0x30] sm:$0xff]   ;;  %v2567_v49 = vrot.slane %v2499_v56, %v399_v48 }
  0x1e   : > { %2131 = vmatprep.subr.bf16.mxu1 %v2321_v54  ;;  %v307_v0 = vld [vmem:[%s2445_s15 + $0xc0] sm:$0xff]  ;;  %v2325_v5 = vld [vmem:[%s3143_s3 + $0x38] sm:$0xff]   ;;  %v309_v6 = vld [vmem:[%s2445_s15 + $0xd0] sm:$0xff] }
  0x1f   : > { %496 = vmatpush1.bf16.msra.mxu0 %v2308_v10  ;;  %v359_v4 = vpack.c.bf16 %v308_v1, %v307_v0  ;;  %v310_v7 = vld [vmem:[%s2445_s15 + $0xd8] sm:$0xff]  ;;  %v311_v9 = vld [vmem:[%s2445_s15 + $0xe0] sm:$0xff]  ;;  %v312_v10 = vld [vmem:[%s2445_s15 + $0xe8] sm:$0xff] }
  0x20   : > { %497 = vmatprep.subr.bf16.mxu0 %v2309_v11  ;;  %v360_v8 = vpack.c.bf16 %v310_v7, %v309_v6  ;;  %v361_v11 = vpack.c.bf16 %v312_v10, %v311_v9  ;;  %v317_v18 = vld [vmem:[%s2445_s15 + $0x110] sm:$0xff]  ;;  %v319_v21 = vld [vmem:[%s2445_s15 + $0x120] sm:$0xff]  ;;  %v336_v46 = vld [vmem:[%s2445_s15 + $0x1a8] sm:$0xff] }
  0x21   : > { %2132 = vmatpush3.bf16.msra.mxu1 %v2321_v54  ;;  %v321_v24 = vld [vmem:[%s2445_s15 + $0x130] sm:$0xff]  ;;  %v323_v27 = vld [vmem:[%s2445_s15 + $0x140] sm:$0xff]  ;;  %v338_v51 = vld [vmem:[%s2445_s15 + $0x1b8] sm:$0xff] }
  0x22   : > { %2133 = vmatprep.subr.bf16.mxu1 %v2322_v60  ;;  %v325_v30 = vld [vmem:[%s2445_s15 + $0x150] sm:$0xff]  ;;  %v327_v33 = vld [vmem:[%s2445_s15 + $0x160] sm:$0xff] }
  0x23   : > { %498 = vmatpush1.bf16.msra.mxu0 %v2311_v12  ;;  %v313_v12 = vld [vmem:[%s2445_s15 + $0xf0] sm:$0xff]  ;;  %v331_v39 = vld [vmem:[%s2445_s15 + $0x180] sm:$0xff] }
  0x24   : > { %499 = vmatprep.subr.bf16.mxu0 %v2312_v13  ;;  %v314_v13 = vld [vmem:[%s2445_s15 + $0xf8] sm:$0xff]  ;;  %v329_v36 = vld [vmem:[%s2445_s15 + $0x170] sm:$0xff]  ;;  %v335_v45 = vld [vmem:[%s2445_s15 + $0x1a0] sm:$0xff] }
  0x25   : > { %2134 = vmatpush3.bf16.msra.mxu1 %v2322_v60  ;;  %v333_v42 = vld [vmem:[%s2445_s15 + $0x190] sm:$0xff]  ;;  %v339_v56 = vld [vmem:[%s2445_s15 + $0x1c0] sm:$0xff] }
  0x26   : > { %2135 = vmatprep.subr.bf16.mxu1 %v2323_v63  ;;  %v337_v50 = vld [vmem:[%s2445_s15 + $0x1b0] sm:$0xff] }
  0x27   : > { %500 = vmatpush1.bf16.msra.mxu0 %v2314_v14  ;;  %v362_v14 = vpack.c.bf16 %v314_v13, %v313_v12  ;;  %v374_v57 = vpack.c.bf16 %v338_v51, %v337_v50  ;;  %v342_v12 = vld [vmem:[%s2445_s15 + $0x1d8] sm:$0xff] }
  0x28   : > { %501 = vmatprep.subr.bf16.mxu0 %v2315_v15  ;;  %v315_v15 = vld [vmem:[%s2445_s15 + $0x100] sm:$0xff] }
  0x29   : > { %2136 = vmatpush3.bf16.msra.mxu1 %v2323_v63  ;;  %v340_v63 = vld [vmem:[%s2445_s15 + $0x1c8] sm:$0xff] }
  0x2a   : > { %2137 = vmatprep.subr.bf16.mxu1 %v2324_v3 }
  0x2b   : > { %502 = vmatpush1.bf16.msra.mxu0 %v2317_v16  ;;  %v316_v16 = vld [vmem:[%s2445_s15 + $0x108] sm:$0xff] }
  0x2c   : > { %v363_v17 = vpack.c.bf16 %v316_v16, %v315_v15 }
  0x2d   : > { %2138 = vmatpush3.bf16.msra.mxu1 %v2324_v3 }
  0x2e   : > { %520 = vmatmul.mubr.bf16.vlgmr.msra.gmra.mrb[0].mxu0 %v347_v19  ;;  %2139 = vmatprep.subr.bf16.mxu1 %v2325_v5  ;;  %v318_v19 = vld [vmem:[%s2445_s15 + $0x118] sm:$0xff] }
  0x2f   : > { %529 = vmatprep.mubr.bf16.mxu0 %v2342_v2  ;;  %v364_v20 = vpack.c.bf16 %v318_v19, %v317_v18 }
  0x31   : > { %2140 = vmatpush3.bf16.msra.mxu1 %v2325_v5  ;;  %v375_v5 = vpack.c.bf16 %v340_v63, %v339_v56 }
  0x36   : > { %530 = vmatmul.mubr.bf16.gmra.mrb[4].mxu0 %v348_v22  ;;  %v320_v22 = vld [vmem:[%s2445_s15 + $0x128] sm:$0xff] }
  0x37   : > { %539 = vmatprep.mubr.bf16.mxu0 %v2342_v2  ;;  %v365_v23 = vpack.c.bf16 %v320_v22, %v319_v21 }
  0x3e   : > { %540 = vmatmul.mubr.bf16.gmra.mrb[8].mxu0 %v349_v25  ;;  %v322_v25 = vld [vmem:[%s2445_s15 + $0x138] sm:$0xff] }
  0x3f   : > { %549 = vmatprep.mubr.bf16.mxu0 %v2342_v2  ;;  %v366_v26 = vpack.c.bf16 %v322_v25, %v321_v24  ;;  %v344_v24 = vld [vmem:[%s2445_s15 + $0x1e8] sm:$0xff] }
  0x46   : > { %550 = vmatmul.mubr.bf16.gmra.mrb[12].mxu0 %v350_v28  ;;  %v324_v28 = vld [vmem:[%s2445_s15 + $0x148] sm:$0xff] }
  0x47   : > { %559 = vmatprep.mubr.bf16.mxu0 %v2342_v2  ;;  %v367_v29 = vpack.c.bf16 %v324_v28, %v323_v27 }
  0x4e   : > { %560 = vmatmul.mubr.bf16.gmra.mrb[16].mxu0 %v351_v31  ;;  %v326_v31 = vld [vmem:[%s2445_s15 + $0x158] sm:$0xff] }
  0x4f   : > { %569 = vmatprep.mubr.bf16.mxu0 %v2342_v2  ;;  %v368_v32 = vpack.c.bf16 %v326_v31, %v325_v30 }
  0x56   : > { %570 = vmatmul.mubr.bf16.gmra.mrb[20].mxu0 %v352_v34  ;;  %v328_v34 = vld [vmem:[%s2445_s15 + $0x168] sm:$0xff] }
  0x57   : > { %579 = vmatprep.mubr.bf16.mxu0 %v2342_v2  ;;  %v369_v35 = vpack.c.bf16 %v328_v34, %v327_v33 }
  0x5e   : > { %580 = vmatmul.mubr.bf16.gmra.mrb[24].mxu0 %v353_v37  ;;  %v330_v37 = vld [vmem:[%s2445_s15 + $0x178] sm:$0xff] }
  0x5f   : > { %589 = vmatprep.mubr.bf16.mxu0 %v2342_v2  ;;  %v370_v38 = vpack.c.bf16 %v330_v37, %v329_v36  ;;  %v346_v36 = vld [vmem:[%s2445_s15 + $0x1f8] sm:$0xff] }
  0x66   : > { %590 = vmatmul.mubr.bf16.gmra.mrb[28].mxu0 %v354_v40  ;;  %v332_v40 = vld [vmem:[%s2445_s15 + $0x188] sm:$0xff] }
  0x67   : > { %599 = vmatprep.mubr.bf16.mxu0 %v2342_v2  ;;  %v371_v41 = vpack.c.bf16 %v332_v40, %v331_v39 }
  0x6e   : > { %600 = vmatmul.mubr.bf16.gmra.mrb[32].mxu0 %v355_v43  ;;  %v334_v43 = vld [vmem:[%s2445_s15 + $0x198] sm:$0xff] }
  0x6f   : > { %609 = vmatprep.mubr.bf16.mxu0 %v2342_v2  ;;  %v372_v44 = vpack.c.bf16 %v334_v43, %v333_v42 }
  0x76   : > { %610 = vmatmul.mubr.bf16.gmra.mrb[36].mxu0 %v356_v47  ;;  %v373_v47 = vpack.c.bf16 %v336_v46, %v335_v45 }
  0x77   : > { %619 = vmatprep.mubr.bf16.mxu0 %v2342_v2 }
  0x7e   : > { %620 = vmatmul.mubr.bf16.gmra.mrb[40].mxu0 %v357_v52 }
  0x7f   : > { %629 = vmatprep.mubr.bf16.mxu0 %v2342_v2 }
  0x86   : > { %630 = vmatmul.mubr.bf16.gmra.mrb[44].mxu0 %v358_v62 }
  0x87   : > { %639 = vmatprep.mubr.bf16.mxu0 %v2342_v2 }
  0x8e   : > { %640 = vmatmul.mubr.bf16.gmra.mrb[48].mxu0 %v359_v4 }
  0x8f   : > { %649 = vmatprep.mubr.bf16.mxu0 %v2342_v2 }
  0x96   : > { %650 = vmatmul.mubr.bf16.gmra.mrb[52].mxu0 %v360_v8 }
  0x97   : > { %659 = vmatprep.mubr.bf16.mxu0 %v2342_v2 }
  0x9e   : > { %660 = vmatmul.mubr.bf16.gmra.mrb[56].mxu0 %v361_v11  ;;  %v341_v11 = vld [vmem:[%s2445_s15 + $0x1d0] sm:$0xff] }
  0x9f   : > { %669 = vmatprep.mubr.bf16.mxu0 %v2342_v2 }
  0xa6   : > { %670 = vmatmul.mubr.bf16.gmra.mrb[60].mxu0 %v362_v14 }
  0xa7   : > { %679 = vmatprep.mubr.bf16.mxu0 %v2342_v2 }
  0xae   : > { %680 = vmatmul.mubr.bf16.gmra.mrb[64].mxu0 %v363_v17  ;;  %v376_v17 = vpack.c.bf16 %v342_v12, %v341_v11 }
  0xaf   : > { %689 = vmatprep.mubr.bf16.mxu0 %v2342_v2 }
  0xb6   : > { %690 = vmatmul.mubr.bf16.gmra.mrb[68].mxu0 %v364_v20 }
  0xb7   : > { %699 = vmatprep.mubr.bf16.mxu0 %v2342_v2 }
  0xbe   : > { %700 = vmatmul.mubr.bf16.gmra.mrb[72].mxu0 %v365_v23  ;;  %v343_v23 = vld [vmem:[%s2445_s15 + $0x1e0] sm:$0xff] }
  0xbf   : > { %709 = vmatprep.mubr.bf16.mxu0 %v2342_v2 }
  0xc6   : > { %710 = vmatmul.mubr.bf16.gmra.mrb[76].mxu0 %v366_v26 }
  0xc7   : > { %719 = vmatprep.mubr.bf16.mxu0 %v2342_v2 }
  0xce   : > { %720 = vmatmul.mubr.bf16.gmra.mrb[80].mxu0 %v367_v29  ;;  %v377_v29 = vpack.c.bf16 %v344_v24, %v343_v23 }
  0xcf   : > { %729 = vmatprep.mubr.bf16.mxu0 %v2342_v2 }
  0xd6   : > { %730 = vmatmul.mubr.bf16.gmra.mrb[84].mxu0 %v368_v32 }
  0xd7   : > { %739 = vmatprep.mubr.bf16.mxu0 %v2342_v2 }
  0xde   : > { %740 = vmatmul.mubr.bf16.gmra.mrb[88].mxu0 %v369_v35  ;;  %v345_v35 = vld [vmem:[%s2445_s15 + $0x1f0] sm:$0xff] }
  0xdf   : > { %749 = vmatprep.mubr.bf16.mxu0 %v2342_v2 }
  0xe6   : > { %750 = vmatmul.mubr.bf16.gmra.mrb[92].mxu0 %v370_v38 }
  0xe7   : > { %759 = vmatprep.mubr.bf16.mxu0 %v2342_v2 }
  0xee   : > { %760 = vmatmul.mubr.bf16.gmra.mrb[96].mxu0 %v371_v41  ;;  %v378_v41 = vpack.c.bf16 %v346_v36, %v345_v35 }
  0xef   : > { %769 = vmatprep.mubr.bf16.mxu0 %v2342_v2 }
  0xf6   : > { %770 = vmatmul.mubr.bf16.gmra.mrb[100].mxu0 %v372_v44 }
  0xf7   : > { %779 = vmatprep.mubr.bf16.mxu0 %v2342_v2 }
  0xfe   : > { %780 = vmatmul.mubr.bf16.gmra.mrb[104].mxu0 %v373_v47 }
  0xff   : > { %789 = vmatprep.mubr.bf16.mxu0 %v2342_v2 }
 0x101   : > { %v521_v52 = vpop.f32.mrb[0].mxu0 }
 0x102   : > { %v522_v53 = vadd.f32 %v521_v52, %v2567_v49  ;;  %v2573_v54 = vpop.f32.mrb[1].mxu0 }
 0x103   : > { %v525_v58 = vpop.f32.mrb[2].mxu0 }
 0x104   : > { %v526_v59 = vadd.f32 %v525_v58, %v2567_v49  ;;  %v2576_v55 = vpop.f32.mrb[3].mxu0  ;;  %v840_v60 = vmax.f32 %v522_v53, 0.0 }
 0x106   : > { %v841_v62 = vmax.f32 %v526_v59, 0.0  ;;  %790 = vmatmul.mubr.bf16.gmra.mrb[108].mxu0 %v374_v57 }
 0x107   : > { %799 = vmatprep.mubr.bf16.mxu0 %v2342_v2 }
 0x108   : > { %v904_v0 = vpack.c.bf16 %v841_v62, %v840_v60 }
 0x109   : > { %v531_v1 = vpop.f32.mrb[4].mxu0 }
 0x10a   : > { %v532_v3 = vadd.f32 %v531_v1, %v2567_v49  ;;  %v2582_v4 = vpop.f32.mrb[5].mxu0  ;;  %2141 = vmatprep.mubr.bf16.mxu1 %v904_v0 }
 0x10b   : > { %v535_v6 = vpop.f32.mrb[6].mxu0 }
 0x10c   : > { %v536_v7 = vadd.f32 %v535_v6, %v2567_v49  ;;  %v2585_v8 = vpop.f32.mrb[7].mxu0  ;;  %v842_v9 = vmax.f32 %v532_v3, 0.0 }
 0x10e   : > { %v843_v10 = vmax.f32 %v536_v7, 0.0  ;;  %800 = vmatmul.mubr.bf16.gmra.mrb[112].mxu0 %v375_v5 }
 0x10f   : > { %809 = vmatprep.mubr.bf16.mxu0 %v2342_v2 }
 0x110   : > { %v905_v13 = vpack.c.bf16 %v843_v10, %v842_v9 }
 0x111   : > { %v541_v14 = vpop.f32.mrb[8].mxu0 }
 0x112   : > { %v542_v15 = vadd.f32 %v541_v14, %v2567_v49  ;;  %v2591_v16 = vpop.f32.mrb[9].mxu0  ;;  %2142 = vmatmul.mubr.bf16.vlgmr.msra.gmra.mrb[0].mxu1 %v905_v13 }
 0x113   : > { %v545_v18 = vpop.f32.mrb[10].mxu0 }
 0x114   : > { %v546_v19 = vadd.f32 %v545_v18, %v2567_v49  ;;  %v2594_v20 = vpop.f32.mrb[11].mxu0  ;;  %v844_v21 = vmax.f32 %v542_v15, 0.0 }
 0x116   : > { %v845_v22 = vmax.f32 %v546_v19, 0.0  ;;  %810 = vmatmul.mubr.bf16.gmra.mrb[116].mxu0 %v376_v17 }
 0x117   : > { %819 = vmatprep.mubr.bf16.mxu0 %v2342_v2 }
 0x118   : > { %v906_v25 = vpack.c.bf16 %v845_v22, %v844_v21 }
 0x119   : > { %v551_v26 = vpop.f32.mrb[12].mxu0 }
 0x11a   : > { %v552_v27 = vadd.f32 %v551_v26, %v2567_v49  ;;  %v2600_v28 = vpop.f32.mrb[13].mxu0  ;;  %2145 = vmatprep.mubr.bf16.mxu1 %v906_v25 }
 0x11b   : > { %v555_v30 = vpop.f32.mrb[14].mxu0 }
 0x11c   : > { %v556_v31 = vadd.f32 %v555_v30, %v2567_v49  ;;  %v2603_v32 = vpop.f32.mrb[15].mxu0  ;;  %v846_v33 = vmax.f32 %v552_v27, 0.0 }
 0x11e   : > { %v847_v34 = vmax.f32 %v556_v31, 0.0  ;;  %820 = vmatmul.mubr.bf16.gmra.mrb[120].mxu0 %v377_v29 }
 0x11f   : > { %829 = vmatprep.mubr.bf16.mxu0 %v2342_v2 }
 0x120   : > { %v907_v37 = vpack.c.bf16 %v847_v34, %v846_v33 }
 0x121   : > { %v561_v38 = vpop.f32.mrb[16].mxu0 }
 0x122   : > { %v562_v39 = vadd.f32 %v561_v38, %v2567_v49  ;;  %v2609_v40 = vpop.f32.mrb[17].mxu0  ;;  %2146 = vmatmul.mubr.bf16.gmra.mrb[4].mxu1 %v907_v37 }
 0x123   : > { %v565_v42 = vpop.f32.mrb[18].mxu0 }
 0x124   : > { %v566_v43 = vadd.f32 %v565_v42, %v2567_v49  ;;  %v2612_v44 = vpop.f32.mrb[19].mxu0  ;;  %v848_v45 = vmax.f32 %v562_v39, 0.0 }
 0x126   : > { %v849_v46 = vmax.f32 %v566_v43, 0.0  ;;  %830 = vmatmul.mubr.bf16.gmra.mrb[124].mxu0 %v378_v41 }
 0x128   : > { %v908_v47 = vpack.c.bf16 %v849_v46, %v848_v45 }
 0x129   : > { %v571_v2 = vpop.f32.mrb[20].mxu0 }
 0x12a   : > { %v572_v48 = vadd.f32 %v571_v2, %v2567_v49  ;;  %v2615_v50 = vpop.f32.mrb[21].mxu0  ;;  %2149 = vmatprep.mubr.bf16.mxu1 %v908_v47 }
 0x12b   : > { %v575_v51 = vpop.f32.mrb[22].mxu0 }
 0x12c   : > { %v576_v52 = vadd.f32 %v575_v51, %v2567_v49  ;;  %v2618_v53 = vpop.f32.mrb[23].mxu0  ;;  %v850_v57 = vmax.f32 %v572_v48, 0.0 }
 0x12e   : > { %v851_v58 = vmax.f32 %v576_v52, 0.0 }
 0x130   : > { %v909_v59 = vpack.c.bf16 %v851_v58, %v850_v57 }
 0x131   : > { %v581_v60 = vpop.f32.mrb[24].mxu0 }
 0x132   : > { %v582_v62 = vadd.f32 %v581_v60, %v2567_v49  ;;  %v2621_v56 = vpop.f32.mrb[25].mxu0  ;;  %2150 = vmatmul.mubr.bf16.gmra.mrb[8].mxu1 %v909_v59 }
 0x133   : > { %v585_v63 = vpop.f32.mrb[26].mxu0 }
 0x134   : > { %v586_v0 = vadd.f32 %v585_v63, %v2567_v49  ;;  %v2624_v1 = vpop.f32.mrb[27].mxu0  ;;  %v852_v3 = vmax.f32 %v582_v62, 0.0 }
 0x136   : > { %v853_v5 = vmax.f32 %v586_v0, 0.0 }
 0x138   : > { %v910_v6 = vpack.c.bf16 %v853_v5, %v852_v3 }
 0x139   : > { %v591_v7 = vpop.f32.mrb[28].mxu0 }
 0x13a   : > { %v592_v9 = vadd.f32 %v591_v7, %v2567_v49  ;;  %v2627_v10 = vpop.f32.mrb[29].mxu0  ;;  %2153 = vmatprep.mubr.bf16.mxu1 %v910_v6 }
 0x13b   : > { %v595_v11 = vpop.f32.mrb[30].mxu0 }
 0x13c   : > { %v596_v12 = vadd.f32 %v595_v11, %v2567_v49  ;;  %v2630_v13 = vpop.f32.mrb[31].mxu0  ;;  %v854_v14 = vmax.f32 %v592_v9, 0.0 }
 0x13e   : > { %v855_v15 = vmax.f32 %v596_v12, 0.0 }
 0x140   : > { %v911_v17 = vpack.c.bf16 %v855_v15, %v854_v14 }
 0x141   : > { %v601_v18 = vpop.f32.mrb[32].mxu0 }
 0x142   : > { %v602_v19 = vadd.f32 %v601_v18, %v2567_v49  ;;  %v2633_v21 = vpop.f32.mrb[33].mxu0  ;;  %2154 = vmatmul.mubr.bf16.gmra.mrb[12].mxu1 %v911_v17  ;;  %v2326_v17 = vld [vmem:[%s3145_s5] sm:$0xff]  }
 0x143   : > { %v605_v22 = vpop.f32.mrb[34].mxu0  ;;  %2205 = vmatprep.subr.bf16.mxu1 %v2326_v17 }
 0x144   : > { %v606_v23 = vadd.f32 %v605_v22, %v2567_v49  ;;  %v2636_v24 = vpop.f32.mrb[35].mxu0  ;;  %v856_v25 = vmax.f32 %v602_v19, 0.0  ;;  %2206 = vmatpush3.bf16.msra.mxu1 %v2326_v17 }
 0x146   : > { %v857_v26 = vmax.f32 %v606_v23, 0.0 }
 0x148   : > { %v912_v27 = vpack.c.bf16 %v857_v26, %v856_v25 }
 0x149   : > { %v611_v29 = vpop.f32.mrb[36].mxu0 }
 0x14a   : > { %v612_v30 = vadd.f32 %v611_v29, %v2567_v49  ;;  %v2639_v31 = vpop.f32.mrb[37].mxu0  ;;  %2157 = vmatprep.mubr.bf16.mxu1 %v912_v27  ;;  %v2327_v27 = vld [vmem:[%s3145_s5 + $0x8] sm:$0xff]  }
 0x14b   : > { %v615_v33 = vpop.f32.mrb[38].mxu0  ;;  %2207 = vmatprep.subr.bf16.mxu1 %v2327_v27 }
 0x14c   : > { %v616_v34 = vadd.f32 %v615_v33, %v2567_v49  ;;  %v2642_v35 = vpop.f32.mrb[39].mxu0  ;;  %v858_v36 = vmax.f32 %v612_v30, 0.0  ;;  %2208 = vmatpush3.bf16.msra.mxu1 %v2327_v27 }
 0x14e   : > { %v859_v37 = vmax.f32 %v616_v34, 0.0  ;;  %v2328_v34 = vld [vmem:[%s3145_s5 + $0x10] sm:$0xff]  }
 0x14f   : > { %2209 = vmatprep.subr.bf16.mxu1 %v2328_v34 }
 0x150   : > { %v913_v38 = vpack.c.bf16 %v859_v37, %v858_v36  ;;  %2210 = vmatpush3.bf16.msra.mxu1 %v2328_v34 }
 0x151   : > { %v621_v39 = vpop.f32.mrb[40].mxu0 }
 0x152   : > { %v622_v41 = vadd.f32 %v621_v39, %v2567_v49  ;;  %v2645_v42 = vpop.f32.mrb[41].mxu0  ;;  %2158 = vmatmul.mubr.bf16.gmra.mrb[16].mxu1 %v913_v38 }
 0x153   : > { %v625_v43 = vpop.f32.mrb[42].mxu0 }
 0x154   : > { %v626_v45 = vadd.f32 %v625_v43, %v2567_v49  ;;  %v2648_v46 = vpop.f32.mrb[43].mxu0  ;;  %v860_v47 = vmax.f32 %v622_v41, 0.0 }
 0x156   : > { %v861_v2 = vmax.f32 %v626_v45, 0.0  ;;  %v2329_v45 = vld [vmem:[%s3145_s5 + $0x18] sm:$0xff]  }
 0x157   : > { %2211 = vmatprep.subr.bf16.mxu1 %v2329_v45 }
 0x158   : > { %v914_v48 = vpack.c.bf16 %v861_v2, %v860_v47  ;;  %2212 = vmatpush3.bf16.msra.mxu1 %v2329_v45 }
 0x159   : > { %v631_v51 = vpop.f32.mrb[44].mxu0 }
 0x15a   : > { %v632_v52 = vadd.f32 %v631_v51, %v2567_v49  ;;  %v2651_v57 = vpop.f32.mrb[45].mxu0  ;;  %2161 = vmatprep.mubr.bf16.mxu1 %v914_v48  ;;  %v2330_v51 = vld [vmem:[%s3145_s5 + $0x20] sm:$0xff]  }
 0x15b   : > { %v635_v58 = vpop.f32.mrb[46].mxu0  ;;  %2213 = vmatprep.subr.bf16.mxu1 %v2330_v51 }
 0x15c   : > { %v636_v59 = vadd.f32 %v635_v58, %v2567_v49  ;;  %v2654_v60 = vpop.f32.mrb[47].mxu0  ;;  %v862_v62 = vmax.f32 %v632_v52, 0.0  ;;  %2214 = vmatpush3.bf16.msra.mxu1 %v2330_v51 }
 0x15e   : > { %v863_v63 = vmax.f32 %v636_v59, 0.0 }
 0x160   : > { %v915_v0 = vpack.c.bf16 %v863_v63, %v862_v62 }
 0x161   : > { %v641_v3 = vpop.f32.mrb[48].mxu0 }
 0x162   : > { %v642_v5 = vadd.f32 %v641_v3, %v2567_v49  ;;  %v2657_v6 = vpop.f32.mrb[49].mxu0  ;;  %2162 = vmatmul.mubr.bf16.gmra.mrb[20].mxu1 %v915_v0  ;;  %v2331_v3 = vld [vmem:[%s3145_s5 + $0x28] sm:$0xff]  }
 0x163   : > { %v645_v7 = vpop.f32.mrb[50].mxu0  ;;  %2215 = vmatprep.subr.bf16.mxu1 %v2331_v3 }
 0x164   : > { %v646_v9 = vadd.f32 %v645_v7, %v2567_v49  ;;  %v2660_v11 = vpop.f32.mrb[51].mxu0  ;;  %v864_v12 = vmax.f32 %v642_v5, 0.0  ;;  %2216 = vmatpush3.bf16.msra.mxu1 %v2331_v3 }
 0x166   : > { %v865_v14 = vmax.f32 %v646_v9, 0.0 }
 0x168   : > { %v916_v15 = vpack.c.bf16 %v865_v14, %v864_v12  ;;  %v2332_v12 = vld [vmem:[%s3145_s5 + $0x30] sm:$0xff]  }
 0x169   : > { %v651_v18 = vpop.f32.mrb[52].mxu0  ;;  %2217 = vmatprep.subr.bf16.mxu1 %v2332_v12 }
 0x16a   : > { %v652_v19 = vadd.f32 %v651_v18, %v2567_v49  ;;  %v2666_v22 = vpop.f32.mrb[53].mxu0  ;;  %2165 = vmatprep.mubr.bf16.mxu1 %v916_v15  ;;  %2218 = vmatpush3.bf16.msra.mxu1 %v2332_v12 }
 0x16b   : > { %v655_v23 = vpop.f32.mrb[54].mxu0 }
 0x16c   : > { %v656_v25 = vadd.f32 %v655_v23, %v2567_v49  ;;  %v2669_v26 = vpop.f32.mrb[55].mxu0  ;;  %v866_v29 = vmax.f32 %v652_v19, 0.0 }
 0x16e   : > { %v867_v30 = vmax.f32 %v656_v25, 0.0  ;;  %v2333_v25 = vld [vmem:[%s3145_s5 + $0x38] sm:$0xff]  }
 0x16f   : > { %2219 = vmatprep.subr.bf16.mxu1 %v2333_v25 }
 0x170   : > { %v917_v33 = vpack.c.bf16 %v867_v30, %v866_v29  ;;  %2220 = vmatpush3.bf16.msra.mxu1 %v2333_v25 }
 0x171   : > { %v661_v36 = vpop.f32.mrb[56].mxu0 }
 0x172   : > { %v662_v37 = vadd.f32 %v661_v36, %v2567_v49  ;;  %v2678_v38 = vpop.f32.mrb[57].mxu0  ;;  %2166 = vmatmul.mubr.bf16.gmra.mrb[24].mxu1 %v917_v33 }
 0x173   : > { %v665_v39 = vpop.f32.mrb[58].mxu0 }
 0x174   : > { %v666_v41 = vadd.f32 %v665_v39, %v2567_v49  ;;  %v2681_v43 = vpop.f32.mrb[59].mxu0  ;;  %v868_v47 = vmax.f32 %v662_v37, 0.0 }
 0x176   : > { %v869_v2 = vmax.f32 %v666_v41, 0.0 }
 0x178   : > { %v918_v48 = vpack.c.bf16 %v869_v2, %v868_v47 }
 0x179   : > { %v671_v52 = vpop.f32.mrb[60].mxu0 }
 0x17a   : > { %v672_v58 = vadd.f32 %v671_v52, %v2567_v49  ;;  %v2690_v59 = vpop.f32.mrb[61].mxu0  ;;  %2169 = vmatprep.mubr.bf16.mxu1 %v918_v48 }
 0x17b   : > { %v675_v62 = vpop.f32.mrb[62].mxu0 }
 0x17c   : > { %v676_v63 = vadd.f32 %v675_v62, %v2567_v49  ;;  %v2693_v0 = vpop.f32.mrb[63].mxu0  ;;  %v870_v5 = vmax.f32 %v672_v58, 0.0 }
 0x17e   : > { %v871_v7 = vmax.f32 %v676_v63, 0.0 }
 0x180   : > { %v919_v9 = vpack.c.bf16 %v871_v7, %v870_v5 }
 0x181   : > { %v681_v14 = vpop.f32.mrb[64].mxu0 }
 0x182   : > { %v682_v15 = vadd.f32 %v681_v14, %v2567_v49  ;;  %v2702_v17 = vpop.f32.mrb[65].mxu0  ;;  %2170 = vmatmul.mubr.bf16.gmra.mrb[28].mxu1 %v919_v9 }
 0x183   : > { %v685_v18 = vpop.f32.mrb[66].mxu0 }
 0x184   : > { %v686_v19 = vadd.f32 %v685_v18, %v2567_v49  ;;  %v2705_v23 = vpop.f32.mrb[67].mxu0  ;;  %v872_v27 = vmax.f32 %v682_v15, 0.0 }
 0x186   : > { %v873_v29 = vmax.f32 %v686_v19, 0.0 }
 0x188   : > { %v920_v30 = vpack.c.bf16 %v873_v29, %v872_v27 }
 0x189   : > { %v691_v33 = vpop.f32.mrb[68].mxu0 }
 0x18a   : > { %v692_v34 = vadd.f32 %v691_v33, %v2567_v49  ;;  %v2711_v36 = vpop.f32.mrb[69].mxu0  ;;  %2173 = vmatprep.mubr.bf16.mxu1 %v920_v30 }
 0x18b   : > { %v695_v37 = vpop.f32.mrb[70].mxu0 }
 0x18c   : > { %v696_v39 = vadd.f32 %v695_v37, %v2567_v49  ;;  %v2714_v41 = vpop.f32.mrb[71].mxu0  ;;  %v874_v45 = vmax.f32 %v692_v34, 0.0 }
 0x18e   : > { %v875_v47 = vmax.f32 %v696_v39, 0.0 }
 0x190   : > { %v921_v2 = vpack.c.bf16 %v875_v47, %v874_v45 }
 0x191   : > { %v701_v48 = vpop.f32.mrb[72].mxu0 }
 0x192   : > { %v702_v51 = vadd.f32 %v701_v48, %v2567_v49  ;;  %v2717_v52 = vpop.f32.mrb[73].mxu0  ;;  %2174 = vmatmul.mubr.bf16.gmra.mrb[32].mxu1 %v921_v2 }
 0x193   : > { %v705_v58 = vpop.f32.mrb[74].mxu0 }
 0x194   : > { %v706_v62 = vadd.f32 %v705_v58, %v2567_v49  ;;  %v2720_v63 = vpop.f32.mrb[75].mxu0  ;;  %v876_v3 = vmax.f32 %v702_v51, 0.0 }
 0x195   : > { %3148 = vst [vmem:[#allocation2_spill] sm:$0xff] %v2720_v63 }
 0x196   : > { %v877_v5 = vmax.f32 %v706_v62, 0.0 }
 0x198   : > { %v922_v7 = vpack.c.bf16 %v877_v5, %v876_v3 }
 0x199   : > { %v711_v9 = vpop.f32.mrb[76].mxu0 }
 0x19a   : > { %v712_v12 = vadd.f32 %v711_v9, %v2567_v49  ;;  %v2723_v14 = vpop.f32.mrb[77].mxu0  ;;  %2177 = vmatprep.mubr.bf16.mxu1 %v922_v7 }
 0x19b   : > { %v715_v15 = vpop.f32.mrb[78].mxu0 }
 0x19c   : > { %v716_v18 = vadd.f32 %v715_v15, %v2567_v49  ;;  %v2726_v19 = vpop.f32.mrb[79].mxu0  ;;  %v878_v25 = vmax.f32 %v712_v12, 0.0 }
 0x19e   : > { %v879_v27 = vmax.f32 %v716_v18, 0.0 }
 0x1a0   : > { %v923_v29 = vpack.c.bf16 %v879_v27, %v878_v25 }
 0x1a1   : > { %v721_v30 = vpop.f32.mrb[80].mxu0 }
 0x1a2   : > { %v722_v33 = vadd.f32 %v721_v30, %v2567_v49  ;;  %v2729_v34 = vpop.f32.mrb[81].mxu0  ;;  %2178 = vmatmul.mubr.bf16.gmra.mrb[36].mxu1 %v923_v29 }
 0x1a3   : > { %3149 = vst [vmem:[#allocation3_spill] sm:$0xff] %v2729_v34  ;;  %v725_v37 = vpop.f32.mrb[82].mxu0 }
 0x1a4   : > { %v726_v39 = vadd.f32 %v725_v37, %v2567_v49  ;;  %v2732_v45 = vpop.f32.mrb[83].mxu0  ;;  %v880_v47 = vmax.f32 %v722_v33, 0.0 }
 0x1a5   : > { %3150 = vst [vmem:[#allocation4_spill] sm:$0xff] %v2732_v45 }
 0x1a6   : > { %v881_v2 = vmax.f32 %v726_v39, 0.0 }
 0x1a8   : > { %v924_v48 = vpack.c.bf16 %v881_v2, %v880_v47 }
 0x1a9   : > { %v731_v51 = vpop.f32.mrb[84].mxu0 }
 0x1aa   : > { %v732_v58 = vadd.f32 %v731_v51, %v2567_v49  ;;  %v2735_v62 = vpop.f32.mrb[85].mxu0  ;;  %2181 = vmatprep.mubr.bf16.mxu1 %v924_v48 }
 0x1ab   : > { %3151 = vst [vmem:[#allocation5_spill] sm:$0xff] %v2735_v62  ;;  %v735_v3 = vpop.f32.mrb[86].mxu0 }
 0x1ac   : > { %v736_v5 = vadd.f32 %v735_v3, %v2567_v49  ;;  %v2738_v7 = vpop.f32.mrb[87].mxu0  ;;  %v882_v9 = vmax.f32 %v732_v58, 0.0 }
 0x1ad   : > { %3152 = vst [vmem:[#allocation6_spill] sm:$0xff] %v2738_v7 }
 0x1ae   : > { %v883_v12 = vmax.f32 %v736_v5, 0.0 }
 0x1b0   : > { %v925_v15 = vpack.c.bf16 %v883_v12, %v882_v9 }
 0x1b1   : > { %v741_v18 = vpop.f32.mrb[88].mxu0 }
 0x1b2   : > { %v742_v25 = vadd.f32 %v741_v18, %v2567_v49  ;;  %v2741_v27 = vpop.f32.mrb[89].mxu0  ;;  %2182 = vmatmul.mubr.bf16.gmra.mrb[40].mxu1 %v925_v15 }
 0x1b3   : > { %3153 = vst [vmem:[#allocation7_spill] sm:$0xff] %v2741_v27  ;;  %v745_v29 = vpop.f32.mrb[90].mxu0 }
 0x1b4   : > { %v746_v30 = vadd.f32 %v745_v29, %v2567_v49  ;;  %v2744_v33 = vpop.f32.mrb[91].mxu0  ;;  %v884_v37 = vmax.f32 %v742_v25, 0.0 }
 0x1b5   : > { %3154 = vst [vmem:[#allocation8_spill] sm:$0xff] %v2744_v33 }
 0x1b6   : > { %v885_v39 = vmax.f32 %v746_v30, 0.0 }
 0x1b8   : > { %v926_v47 = vpack.c.bf16 %v885_v39, %v884_v37 }
 0x1b9   : > { %v751_v2 = vpop.f32.mrb[92].mxu0 }
 0x1ba   : > { %v752_v48 = vadd.f32 %v751_v2, %v2567_v49  ;;  %v2747_v51 = vpop.f32.mrb[93].mxu0  ;;  %2185 = vmatprep.mubr.bf16.mxu1 %v926_v47 }
 0x1bb   : > { %3155 = vst [vmem:[#allocation9_spill] sm:$0xff] %v2747_v51  ;;  %v755_v58 = vpop.f32.mrb[94].mxu0 }
 0x1bc   : > { %v756_v3 = vadd.f32 %v755_v58, %v2567_v49  ;;  %v2750_v5 = vpop.f32.mrb[95].mxu0  ;;  %v886_v9 = vmax.f32 %v752_v48, 0.0 }
 0x1bd   : > { %3156 = vst [vmem:[#allocation10_spill] sm:$0xff] %v2750_v5 }
 0x1be   : > { %v887_v12 = vmax.f32 %v756_v3, 0.0 }
 0x1c0   : > { %v927_v15 = vpack.c.bf16 %v887_v12, %v886_v9 }
 0x1c1   : > { %v761_v18 = vpop.f32.mrb[96].mxu0 }
 0x1c2   : > { %v762_v29 = vadd.f32 %v761_v18, %v2567_v49  ;;  %v2753_v25 = vpop.f32.mrb[97].mxu0  ;;  %2186 = vmatmul.mubr.bf16.gmra.mrb[44].mxu1 %v927_v15 }
 0x1c3   : > { %3157 = vst [vmem:[#allocation11_spill] sm:$0xff] %v2753_v25  ;;  %v765_v30 = vpop.f32.mrb[98].mxu0 }
 0x1c4   : > { %v766_v37 = vadd.f32 %v765_v30, %v2567_v49  ;;  %v2756_v39 = vpop.f32.mrb[99].mxu0  ;;  %v888_v47 = vmax.f32 %v762_v29, 0.0 }
 0x1c5   : > { %3158 = vst [vmem:[#allocation12_spill] sm:$0xff] %v2756_v39 }
 0x1c6   : > { %v889_v2 = vmax.f32 %v766_v37, 0.0 }
 0x1c8   : > { %v928_v33 = vpack.c.bf16 %v889_v2, %v888_v47 }
 0x1c9   : > { %v771_v58 = vpop.f32.mrb[100].mxu0 }
 0x1ca   : > { %v772_v5 = vadd.f32 %v771_v58, %v2567_v49  ;;  %v2759_v48 = vpop.f32.mrb[101].mxu0  ;;  %2189 = vmatprep.mubr.bf16.mxu1 %v928_v33 }
 0x1cb   : > { %3159 = vst [vmem:[#allocation13_spill] sm:$0xff] %v2759_v48  ;;  %v775_v3 = vpop.f32.mrb[102].mxu0 }
 0x1cc   : > { %v776_v9 = vadd.f32 %v775_v3, %v2567_v49  ;;  %v2762_v12 = vpop.f32.mrb[103].mxu0  ;;  %v890_v15 = vmax.f32 %v772_v5, 0.0 }
 0x1cd   : > { %3160 = vst [vmem:[#allocation14_spill] sm:$0xff] %v2762_v12 }
 0x1ce   : > { %v891_v18 = vmax.f32 %v776_v9, 0.0 }
 0x1d0   : > { %v929_v25 = vpack.c.bf16 %v891_v18, %v890_v15 }
 0x1d1   : > { %v781_v30 = vpop.f32.mrb[104].mxu0 }
 0x1d2   : > { %v782_v39 = vadd.f32 %v781_v30, %v2567_v49  ;;  %v2765_v29 = vpop.f32.mrb[105].mxu0  ;;  %2190 = vmatmul.mubr.bf16.gmra.mrb[48].mxu1 %v929_v25 }
 0x1d3   : > { %3161 = vst [vmem:[#allocation15_spill] sm:$0xff] %v2765_v29  ;;  %v785_v37 = vpop.f32.mrb[106].mxu0 }
 0x1d4   : > { %v786_v47 = vadd.f32 %v785_v37, %v2567_v49  ;;  %v2768_v2 = vpop.f32.mrb[107].mxu0  ;;  %v892_v33 = vmax.f32 %v782_v39, 0.0 }
 0x1d5   : > { %3162 = vst [vmem:[#allocation16_spill] sm:$0xff] %v2768_v2 }
 0x1d6   : > { %v893_v58 = vmax.f32 %v786_v47, 0.0 }
 0x1d8   : > { %v930_v48 = vpack.c.bf16 %v893_v58, %v892_v33  ;;  %v2782_v33 = vld [vmem:[%s3144_s4] ss:$0 sm:$0xff] }
 0x1d9   : > { %v791_v3 = vpop.f32.mrb[108].mxu0 }
 0x1da   : > { %v792_v12 = vadd.f32 %v791_v3, %v2567_v49  ;;  %v2771_v5 = vpop.f32.mrb[109].mxu0  ;;  %2193 = vmatprep.mubr.bf16.mxu1 %v930_v48 }
 0x1db   : > { %3163 = vst [vmem:[#allocation17_spill] sm:$0xff] %v2771_v5  ;;  %v795_v9 = vpop.f32.mrb[110].mxu0 }
 0x1dc   : > { %v796_v15 = vadd.f32 %v795_v9, %v2567_v49  ;;  %v2774_v18 = vpop.f32.mrb[111].mxu0  ;;  %v894_v25 = vmax.f32 %v792_v12, 0.0 }
 0x1dd   : > { %3164 = vst [vmem:[#allocation18_spill] sm:$0xff] %v2774_v18 }
 0x1de   : > { %v895_v30 = vmax.f32 %v796_v15, 0.0 }
 0x1e0   : > { %v931_v29 = vpack.c.bf16 %v895_v30, %v894_v25 }
 0x1e1   : > { %v801_v37 = vpop.f32.mrb[112].mxu0 }
 0x1e2   : > { %v802_v2 = vadd.f32 %v801_v37, %v2567_v49  ;;  %v2777_v39 = vpop.f32.mrb[113].mxu0  ;;  %2194 = vmatmul.mubr.bf16.gmra.mrb[52].mxu1 %v931_v29 }
 0x1e3   : > { %3165 = vst [vmem:[#allocation19_spill] sm:$0xff] %v2777_v39  ;;  %v805_v47 = vpop.f32.mrb[114].mxu0 }
 0x1e4   : > { %v806_v48 = vadd.f32 %v805_v47, %v2567_v49  ;;  %v2785_v58 = vpop.f32.mrb[115].mxu0  ;;  %v896_v12 = vmax.f32 %v802_v2, 0.0 }
 0x1e5   : > { %3166 = vst [vmem:[#allocation20_spill] sm:$0xff] %v2785_v58  ;;  %v2143_v3 = vpop.f32.mrb[0].mxu1 }
 0x1e6   : > { %v897_v9 = vmax.f32 %v806_v48, 0.0  ;;  %v1050_v15 = vadd.f32 %v2143_v3, %v2782_v33  ;;  %v1041_v25 = vpop.f32.mrb[1].mxu1 }
 0x1e7   : > { %v1042_v30 = vadd.f32 %v2782_v33, %v1041_v25  ;;  %v2144_v37 = vpop.f32.mrb[2].mxu1 }
 0x1e8   : > { %v932_v29 = vpack.c.bf16 %v897_v9, %v896_v12  ;;  %v1053_v39 = vadd.f32 %v2144_v37, %v2782_v33  ;;  %v1044_v18 = vpop.f32.mrb[3].mxu1  ;;  %v1298_v51 = vmax.f32 %v1050_v15, 0.0 }
 0x1e9   : > { %v1045_v5 = vadd.f32 %v2782_v33, %v1044_v18  ;;  %v811_v27 = vpop.f32.mrb[116].mxu0  ;;  %v1296_v2 = vmax.f32 %v1042_v30, 0.0 }
 0x1ea   : > { %v1299_v47 = vmax.f32 %v1053_v39, 0.0  ;;  %v812_v58 = vadd.f32 %v811_v27, %v2567_v49  ;;  %v2792_v45 = vpop.f32.mrb[117].mxu0  ;;  %2197 = vmatprep.mubr.bf16.mxu1 %v932_v29 }
 0x1eb   : > { %3167 = vst [vmem:[#allocation21_spill] sm:$0xff] %v2792_v45  ;;  %v1297_v48 = vmax.f32 %v1045_v5, 0.0  ;;  %v815_v3 = vpop.f32.mrb[118].mxu0 }
 0x1ec   : > { %v1361_v7 = vpack.c.bf16 %v1299_v47, %v1298_v51  ;;  %v816_v25 = vadd.f32 %v815_v3, %v2567_v49  ;;  %v2795_v12 = vpop.f32.mrb[119].mxu0  ;;  %v898_v37 = vmax.f32 %v812_v58, 0.0 }
 0x1ed   : > { %3168 = vst [vmem:[#allocation22_spill] sm:$0xff] %v2795_v12  ;;  %v1360_v9 = vpack.c.bf16 %v1297_v48, %v1296_v2 }
 0x1ee   : > { %v899_v34 = vmax.f32 %v816_v25, 0.0 }
 0x1f0   : > { %v933_v18 = vpack.c.bf16 %v899_v34, %v898_v37 }
 0x1f1   : > { %v821_v62 = vpop.f32.mrb[120].mxu0 }
 0x1f2   : > { %v822_v39 = vadd.f32 %v821_v62, %v2567_v49  ;;  %v2798_v15 = vpop.f32.mrb[121].mxu0  ;;  %2198 = vmatmul.mubr.bf16.gmra.mrb[56].mxu1 %v933_v18 }
 0x1f3   : > { %3169 = vst [vmem:[#allocation23_spill] sm:$0xff] %v2798_v15  ;;  %v825_v27 = vpop.f32.mrb[122].mxu0 }
 0x1f4   : > { %v826_v30 = vadd.f32 %v825_v27, %v2567_v49  ;;  %v2801_v5 = vpop.f32.mrb[123].mxu0  ;;  %v900_v29 = vmax.f32 %v822_v39, 0.0 }
 0x1f5   : > { %3170 = vst [vmem:[#allocation24_spill] sm:$0xff] %v2801_v5  ;;  %v2147_v51 = vpop.f32.mrb[4].mxu1 }
 0x1f6   : > { %v901_v47 = vmax.f32 %v826_v30, 0.0  ;;  %v1066_v3 = vadd.f32 %v2147_v51, %v2782_v33  ;;  %v1057_v2 = vpop.f32.mrb[5].mxu1 }
 0x1f7   : > { %v1058_v58 = vadd.f32 %v2782_v33, %v1057_v2  ;;  %v2148_v34 = vpop.f32.mrb[6].mxu1 }
 0x1f8   : > { %v934_v48 = vpack.c.bf16 %v901_v47, %v900_v29  ;;  %v1069_v62 = vadd.f32 %v2148_v34, %v2782_v33  ;;  %v1060_v25 = vpop.f32.mrb[7].mxu1  ;;  %v1302_v15 = vmax.f32 %v1066_v3, 0.0 }
 0x1f9   : > { %v1061_v37 = vadd.f32 %v2782_v33, %v1060_v25  ;;  %v831_v18 = vpop.f32.mrb[124].mxu0  ;;  %v1300_v39 = vmax.f32 %v1058_v58, 0.0 }
 0x1fa   : > { %v1303_v27 = vmax.f32 %v1069_v62, 0.0  ;;  %v832_v5 = vadd.f32 %v831_v18, %v2567_v49  ;;  %v2808_v12 = vpop.f32.mrb[125].mxu0  ;;  %2201 = vmatprep.mubr.bf16.mxu1 %v934_v48 }
 0x1fb   : > { %v1301_v30 = vmax.f32 %v1061_v37, 0.0  ;;  %v835_v51 = vpop.f32.mrb[126].mxu0 }
 0x1fc   : > { %v1363_v45 = vpack.c.bf16 %v1303_v27, %v1302_v15  ;;  %v836_v2 = vadd.f32 %v835_v51, %v2567_v49  ;;  %v2811_v29 = vpop.f32.mrb[127].mxu0  ;;  %v902_v34 = vmax.f32 %v832_v5, 0.0 }
 0x1fd   : > { %v1362_v47 = vpack.c.bf16 %v1301_v30, %v1300_v39 }
 0x1fe   : > { %v903_v63 = vmax.f32 %v836_v2, 0.0 }
 0x200   : > { %v935_v25 = vpack.c.bf16 %v903_v63, %v902_v34 }
 0x202   : > { %2202 = vmatmul.mubr.bf16.gmra.mrb[60].mxu1 %v935_v25 }
 0x203   : > { %2221 = vmatprep.mubr.bf16.mxu1 %v1360_v9 }
 0x205   : > { %v2151_v3 = vpop.f32.mrb[8].mxu1 }
 0x206   : > { %v1082_v62 = vadd.f32 %v2151_v3, %v2782_v33  ;;  %v1073_v18 = vpop.f32.mrb[9].mxu1 }
 0x207   : > { %v1074_v48 = vadd.f32 %v2782_v33, %v1073_v18  ;;  %v2152_v58 = vpop.f32.mrb[10].mxu1 }
 0x208   : > { %v1085_v37 = vadd.f32 %v2152_v58, %v2782_v33  ;;  %v1076_v15 = vpop.f32.mrb[11].mxu1  ;;  %v1306_v27 = vmax.f32 %v1082_v62, 0.0 }
 0x209   : > { %v1077_v49 = vadd.f32 %v2782_v33, %v1076_v15  ;;  %v1304_v5 = vmax.f32 %v1074_v48, 0.0 }
 0x20a   : > { %v1307_v51 = vmax.f32 %v1085_v37, 0.0  ;;  %2222 = vmatmul.mubr.bf16.vlgmr.msra.gmra.mrb[64].mxu1 %v1361_v7 }
 0x20b   : > { %v1305_v39 = vmax.f32 %v1077_v49, 0.0  ;;  %2225 = vmatprep.mubr.bf16.mxu1 %v1362_v47 }
 0x20c   : > { %v1365_v63 = vpack.c.bf16 %v1307_v51, %v1306_v27 }
 0x20d   : > { %v1364_v9 = vpack.c.bf16 %v1305_v39, %v1304_v5 }
 0x212   : > { %2226 = vmatmul.mubr.bf16.gmra.mrb[68].mxu1 %v1363_v45 }
 0x213   : > { %2229 = vmatprep.mubr.bf16.mxu1 %v1364_v9 }
 0x215   : > { %v2155_v30 = vpop.f32.mrb[12].mxu1 }
 0x216   : > { %v1098_v2 = vadd.f32 %v2155_v30, %v2782_v33  ;;  %v1089_v34 = vpop.f32.mrb[13].mxu1 }
 0x217   : > { %v1090_v25 = vadd.f32 %v2782_v33, %v1089_v34  ;;  %v2156_v3 = vpop.f32.mrb[14].mxu1 }
 0x218   : > { %v1101_v18 = vadd.f32 %v2156_v3, %v2782_v33  ;;  %v1092_v58 = vpop.f32.mrb[15].mxu1  ;;  %v1310_v7 = vmax.f32 %v1098_v2, 0.0 }
 0x219   : > { %v1093_v62 = vadd.f32 %v2782_v33, %v1092_v58  ;;  %v1308_v47 = vmax.f32 %v1090_v25, 0.0 }
 0x21a   : > { %v1311_v48 = vmax.f32 %v1101_v18, 0.0  ;;  %2230 = vmatmul.mubr.bf16.gmra.mrb[72].mxu1 %v1365_v63 }
 0x21b   : > { %v1309_v37 = vmax.f32 %v1093_v62, 0.0 }
 0x21c   : > { %v1367_v15 = vpack.c.bf16 %v1311_v48, %v1310_v7 }
 0x21d   : > { %v1366_v45 = vpack.c.bf16 %v1309_v37, %v1308_v47 }
 0x21f   : > { %2233 = vmatprep.mubr.bf16.mxu1 %v1366_v45 }
 0x222   : > { %2234 = vmatmul.mubr.bf16.gmra.mrb[76].mxu1 %v1367_v15 }
 0x225   : > { %v2159_v49 = vpop.f32.mrb[16].mxu1 }
 0x226   : > { %v1114_v27 = vadd.f32 %v2159_v49, %v2782_v33  ;;  %v1105_v51 = vpop.f32.mrb[17].mxu1 }
 0x227   : > { %v1106_v5 = vadd.f32 %v2782_v33, %v1105_v51  ;;  %v2160_v39 = vpop.f32.mrb[18].mxu1 }
 0x228   : > { %v1117_v9 = vadd.f32 %v2160_v39, %v2782_v33  ;;  %v1108_v30 = vpop.f32.mrb[19].mxu1  ;;  %v1314_v34 = vmax.f32 %v1114_v27, 0.0 }
 0x229   : > { %v1109_v2 = vadd.f32 %v2782_v33, %v1108_v30  ;;  %v1312_v25 = vmax.f32 %v1106_v5, 0.0 }
 0x22a   : > { %v1315_v63 = vmax.f32 %v1117_v9, 0.0 }
 0x22b   : > { %v1313_v3 = vmax.f32 %v1109_v2, 0.0 }
 0x22c   : > { %v1369_v18 = vpack.c.bf16 %v1315_v63, %v1314_v34 }
 0x22d   : > { %v1368_v58 = vpack.c.bf16 %v1313_v3, %v1312_v25 }
 0x22f   : > { %2237 = vmatprep.mubr.bf16.mxu1 %v1368_v58 }
 0x230   : > { %2238 = vmatmul.mubr.bf16.gmra.mrb[80].mxu1 %v1369_v18 }
 0x235   : > { %v2163_v62 = vpop.f32.mrb[20].mxu1 }
 0x236   : > { %v1130_v7 = vadd.f32 %v2163_v62, %v2782_v33  ;;  %v1121_v48 = vpop.f32.mrb[21].mxu1 }
 0x237   : > { %v1122_v47 = vadd.f32 %v2782_v33, %v1121_v48  ;;  %v2164_v37 = vpop.f32.mrb[22].mxu1 }
 0x238   : > { %v1133_v15 = vadd.f32 %v2164_v37, %v2782_v33  ;;  %v1124_v45 = vpop.f32.mrb[23].mxu1  ;;  %v1318_v27 = vmax.f32 %v1130_v7, 0.0 }
 0x239   : > { %v1125_v49 = vadd.f32 %v2782_v33, %v1124_v45  ;;  %v1316_v5 = vmax.f32 %v1122_v47, 0.0 }
 0x23a   : > { %v1319_v51 = vmax.f32 %v1133_v15, 0.0 }
 0x23b   : > { %v1317_v39 = vmax.f32 %v1125_v49, 0.0 }
 0x23c   : > { %v1371_v9 = vpack.c.bf16 %v1319_v51, %v1318_v27 }
 0x23d   : > { %v1370_v30 = vpack.c.bf16 %v1317_v39, %v1316_v5 }
 0x23f   : > { %2241 = vmatprep.mubr.bf16.mxu1 %v1370_v30 }
 0x240   : > { %2242 = vmatmul.mubr.bf16.gmra.mrb[84].mxu1 %v1371_v9 }
 0x245   : > { %v2167_v2 = vpop.f32.mrb[24].mxu1 }
 0x246   : > { %v1146_v34 = vadd.f32 %v2167_v2, %v2782_v33  ;;  %v1137_v63 = vpop.f32.mrb[25].mxu1 }
 0x247   : > { %v1138_v25 = vadd.f32 %v2782_v33, %v1137_v63  ;;  %v2168_v3 = vpop.f32.mrb[26].mxu1 }
 0x248   : > { %v1149_v18 = vadd.f32 %v2168_v3, %v2782_v33  ;;  %v1140_v58 = vpop.f32.mrb[27].mxu1  ;;  %v1322_v7 = vmax.f32 %v1146_v34, 0.0 }
 0x249   : > { %v1141_v62 = vadd.f32 %v2782_v33, %v1140_v58  ;;  %v1320_v47 = vmax.f32 %v1138_v25, 0.0 }
 0x24a   : > { %v1323_v48 = vmax.f32 %v1149_v18, 0.0 }
 0x24b   : > { %v1321_v37 = vmax.f32 %v1141_v62, 0.0 }
 0x24c   : > { %v1373_v15 = vpack.c.bf16 %v1323_v48, %v1322_v7 }
 0x24d   : > { %v1372_v45 = vpack.c.bf16 %v1321_v37, %v1320_v47 }
 0x24f   : > { %2245 = vmatprep.mubr.bf16.mxu1 %v1372_v45 }
 0x250   : > { %2246 = vmatmul.mubr.bf16.gmra.mrb[88].mxu1 %v1373_v15 }
 0x255   : > { %v2171_v49 = vpop.f32.mrb[28].mxu1 }
 0x256   : > { %v1162_v27 = vadd.f32 %v2171_v49, %v2782_v33  ;;  %v1153_v51 = vpop.f32.mrb[29].mxu1 }
 0x257   : > { %v1154_v5 = vadd.f32 %v2782_v33, %v1153_v51  ;;  %v2172_v39 = vpop.f32.mrb[30].mxu1 }
 0x258   : > { %v1165_v9 = vadd.f32 %v2172_v39, %v2782_v33  ;;  %v1156_v30 = vpop.f32.mrb[31].mxu1  ;;  %v1326_v34 = vmax.f32 %v1162_v27, 0.0 }
 0x259   : > { %v1157_v2 = vadd.f32 %v2782_v33, %v1156_v30  ;;  %v1324_v25 = vmax.f32 %v1154_v5, 0.0 }
 0x25a   : > { %v1327_v63 = vmax.f32 %v1165_v9, 0.0 }
 0x25b   : > { %v1325_v3 = vmax.f32 %v1157_v2, 0.0 }
 0x25c   : > { %v1375_v18 = vpack.c.bf16 %v1327_v63, %v1326_v34 }
 0x25d   : > { %v1374_v58 = vpack.c.bf16 %v1325_v3, %v1324_v25 }
 0x25f   : > { %2249 = vmatprep.mubr.bf16.mxu1 %v1374_v58 }
 0x260   : > { %2250 = vmatmul.mubr.bf16.gmra.mrb[92].mxu1 %v1375_v18 }
 0x265   : > { %v2175_v62 = vpop.f32.mrb[32].mxu1 }
 0x266   : > { %v1178_v7 = vadd.f32 %v2175_v62, %v2782_v33  ;;  %v1169_v48 = vpop.f32.mrb[33].mxu1 }
 0x267   : > { %v1170_v47 = vadd.f32 %v2782_v33, %v1169_v48  ;;  %v2176_v37 = vpop.f32.mrb[34].mxu1 }
 0x268   : > { %v1181_v15 = vadd.f32 %v2176_v37, %v2782_v33  ;;  %v1172_v45 = vpop.f32.mrb[35].mxu1  ;;  %v1330_v27 = vmax.f32 %v1178_v7, 0.0 }
 0x269   : > { %v1173_v49 = vadd.f32 %v2782_v33, %v1172_v45  ;;  %v1328_v5 = vmax.f32 %v1170_v47, 0.0 }
 0x26a   : > { %v1331_v51 = vmax.f32 %v1181_v15, 0.0 }
 0x26b   : > { %v1329_v39 = vmax.f32 %v1173_v49, 0.0 }
 0x26c   : > { %v1377_v9 = vpack.c.bf16 %v1331_v51, %v1330_v27 }
 0x26d   : > { %v1376_v30 = vpack.c.bf16 %v1329_v39, %v1328_v5 }
 0x26f   : > { %2253 = vmatprep.mubr.bf16.mxu1 %v1376_v30 }
 0x270   : > { %2254 = vmatmul.mubr.bf16.gmra.mrb[96].mxu1 %v1377_v9 }
 0x275   : > { %v2179_v2 = vpop.f32.mrb[36].mxu1 }
 0x276   : > { %v1194_v34 = vadd.f32 %v2179_v2, %v2782_v33  ;;  %v1185_v63 = vpop.f32.mrb[37].mxu1 }
 0x277   : > { %v1186_v25 = vadd.f32 %v2782_v33, %v1185_v63  ;;  %v2180_v3 = vpop.f32.mrb[38].mxu1 }
 0x278   : > { %v1197_v18 = vadd.f32 %v2180_v3, %v2782_v33  ;;  %v1188_v58 = vpop.f32.mrb[39].mxu1  ;;  %v1334_v7 = vmax.f32 %v1194_v34, 0.0 }
 0x279   : > { %v1189_v62 = vadd.f32 %v2782_v33, %v1188_v58  ;;  %v1332_v47 = vmax.f32 %v1186_v25, 0.0 }
 0x27a   : > { %v1335_v48 = vmax.f32 %v1197_v18, 0.0 }
 0x27b   : > { %v1333_v37 = vmax.f32 %v1189_v62, 0.0 }
 0x27c   : > { %v1379_v15 = vpack.c.bf16 %v1335_v48, %v1334_v7 }
 0x27d   : > { %v1378_v45 = vpack.c.bf16 %v1333_v37, %v1332_v47 }
 0x27f   : > { %2257 = vmatprep.mubr.bf16.mxu1 %v1378_v45 }
 0x280   : > { %2258 = vmatmul.mubr.bf16.gmra.mrb[100].mxu1 %v1379_v15 }
 0x285   : > { %v2183_v49 = vpop.f32.mrb[40].mxu1 }
 0x286   : > { %v1210_v27 = vadd.f32 %v2183_v49, %v2782_v33  ;;  %v1201_v51 = vpop.f32.mrb[41].mxu1 }
 0x287   : > { %v1202_v5 = vadd.f32 %v2782_v33, %v1201_v51  ;;  %v2184_v39 = vpop.f32.mrb[42].mxu1 }
 0x288   : > { %v1213_v9 = vadd.f32 %v2184_v39, %v2782_v33  ;;  %v1204_v30 = vpop.f32.mrb[43].mxu1  ;;  %v1338_v34 = vmax.f32 %v1210_v27, 0.0 }
 0x289   : > { %v1205_v2 = vadd.f32 %v2782_v33, %v1204_v30  ;;  %v1336_v25 = vmax.f32 %v1202_v5, 0.0 }
 0x28a   : > { %v1339_v63 = vmax.f32 %v1213_v9, 0.0 }
 0x28b   : > { %v1337_v3 = vmax.f32 %v1205_v2, 0.0 }
 0x28c   : > { %v1381_v18 = vpack.c.bf16 %v1339_v63, %v1338_v34 }
 0x28d   : > { %v1380_v58 = vpack.c.bf16 %v1337_v3, %v1336_v25 }
 0x28f   : > { %2261 = vmatprep.mubr.bf16.mxu1 %v1380_v58 }
 0x290   : > { %2262 = vmatmul.mubr.bf16.gmra.mrb[104].mxu1 %v1381_v18 }
 0x295   : > { %v2187_v62 = vpop.f32.mrb[44].mxu1 }
 0x296   : > { %v1226_v7 = vadd.f32 %v2187_v62, %v2782_v33  ;;  %v1217_v48 = vpop.f32.mrb[45].mxu1 }
 0x297   : > { %v1218_v47 = vadd.f32 %v2782_v33, %v1217_v48  ;;  %v2188_v37 = vpop.f32.mrb[46].mxu1 }
 0x298   : > { %v1229_v15 = vadd.f32 %v2188_v37, %v2782_v33  ;;  %v1220_v45 = vpop.f32.mrb[47].mxu1  ;;  %v1342_v27 = vmax.f32 %v1226_v7, 0.0 }
 0x299   : > { %v1221_v49 = vadd.f32 %v2782_v33, %v1220_v45  ;;  %v1340_v5 = vmax.f32 %v1218_v47, 0.0 }
 0x29a   : > { %v1343_v51 = vmax.f32 %v1229_v15, 0.0 }
 0x29b   : > { %v1341_v39 = vmax.f32 %v1221_v49, 0.0 }
 0x29c   : > { %v1383_v9 = vpack.c.bf16 %v1343_v51, %v1342_v27 }
 0x29d   : > { %v1382_v30 = vpack.c.bf16 %v1341_v39, %v1340_v5 }
 0x29f   : > { %2265 = vmatprep.mubr.bf16.mxu1 %v1382_v30 }
 0x2a0   : > { %2266 = vmatmul.mubr.bf16.gmra.mrb[108].mxu1 %v1383_v9 }
 0x2a5   : > { %v2191_v2 = vpop.f32.mrb[48].mxu1 }
 0x2a6   : > { %v1242_v34 = vadd.f32 %v2191_v2, %v2782_v33  ;;  %v1233_v63 = vpop.f32.mrb[49].mxu1 }
 0x2a7   : > { %v1234_v25 = vadd.f32 %v2782_v33, %v1233_v63  ;;  %v2192_v3 = vpop.f32.mrb[50].mxu1 }
 0x2a8   : > { %v1245_v18 = vadd.f32 %v2192_v3, %v2782_v33  ;;  %v1236_v58 = vpop.f32.mrb[51].mxu1  ;;  %v1346_v7 = vmax.f32 %v1242_v34, 0.0 }
 0x2a9   : > { %v1237_v62 = vadd.f32 %v2782_v33, %v1236_v58  ;;  %v1344_v47 = vmax.f32 %v1234_v25, 0.0 }
 0x2aa   : > { %v1347_v48 = vmax.f32 %v1245_v18, 0.0 }
 0x2ab   : > { %v1345_v37 = vmax.f32 %v1237_v62, 0.0 }
 0x2ac   : > { %v1385_v15 = vpack.c.bf16 %v1347_v48, %v1346_v7 }
 0x2ad   : > { %v1384_v45 = vpack.c.bf16 %v1345_v37, %v1344_v47 }
 0x2af   : > { %2269 = vmatprep.mubr.bf16.mxu1 %v1384_v45 }
 0x2b0   : > { %2270 = vmatmul.mubr.bf16.gmra.mrb[112].mxu1 %v1385_v15 }
 0x2b5   : > { %v2195_v49 = vpop.f32.mrb[52].mxu1 }
 0x2b6   : > { %v1258_v27 = vadd.f32 %v2195_v49, %v2782_v33  ;;  %v1249_v51 = vpop.f32.mrb[53].mxu1 }
 0x2b7   : > { %v1250_v5 = vadd.f32 %v2782_v33, %v1249_v51  ;;  %v2196_v39 = vpop.f32.mrb[54].mxu1 }
 0x2b8   : > { %v1261_v9 = vadd.f32 %v2196_v39, %v2782_v33  ;;  %v1252_v30 = vpop.f32.mrb[55].mxu1  ;;  %v1350_v34 = vmax.f32 %v1258_v27, 0.0 }
 0x2b9   : > { %v1253_v2 = vadd.f32 %v2782_v33, %v1252_v30  ;;  %v1348_v25 = vmax.f32 %v1250_v5, 0.0 }
 0x2ba   : > { %v1351_v63 = vmax.f32 %v1261_v9, 0.0 }
 0x2bb   : > { %v1349_v3 = vmax.f32 %v1253_v2, 0.0 }
 0x2bc   : > { %v1387_v18 = vpack.c.bf16 %v1351_v63, %v1350_v34 }
 0x2bd   : > { %v1386_v58 = vpack.c.bf16 %v1349_v3, %v1348_v25 }
 0x2bf   : > { %2273 = vmatprep.mubr.bf16.mxu1 %v1386_v58 }
 0x2c0   : > { %2274 = vmatmul.mubr.bf16.gmra.mrb[116].mxu1 %v1387_v18 }
 0x2c5   : > { %v2199_v62 = vpop.f32.mrb[56].mxu1 }
 0x2c6   : > { %v1274_v7 = vadd.f32 %v2199_v62, %v2782_v33  ;;  %v1265_v48 = vpop.f32.mrb[57].mxu1 }
 0x2c7   : > { %v1266_v47 = vadd.f32 %v2782_v33, %v1265_v48  ;;  %v2200_v37 = vpop.f32.mrb[58].mxu1 }
 0x2c8   : > { %v1277_v15 = vadd.f32 %v2200_v37, %v2782_v33  ;;  %v1268_v45 = vpop.f32.mrb[59].mxu1  ;;  %v1354_v27 = vmax.f32 %v1274_v7, 0.0 }
 0x2c9   : > { %v1269_v49 = vadd.f32 %v2782_v33, %v1268_v45  ;;  %v1352_v5 = vmax.f32 %v1266_v47, 0.0 }
 0x2ca   : > { %v1355_v51 = vmax.f32 %v1277_v15, 0.0  ;;  %v2872_v15 = vld [vmem:[%s3146_s6] ss:$0 sm:$0xff] }
 0x2cb   : > { %v1353_v39 = vmax.f32 %v1269_v49, 0.0 }
 0x2cc   : > { %v1389_v9 = vpack.c.bf16 %v1355_v51, %v1354_v27 }
 0x2cd   : > { %v1388_v30 = vpack.c.bf16 %v1353_v39, %v1352_v5 }
 0x2cf   : > { %2277 = vmatprep.mubr.bf16.mxu1 %v1388_v30 }
 0x2d0   : > { %2278 = vmatmul.mubr.bf16.gmra.mrb[120].mxu1 %v1389_v9 }
 0x2d5   : > { %v2203_v2 = vpop.f32.mrb[60].mxu1 }
 0x2d6   : > { %v1290_v34 = vadd.f32 %v2203_v2, %v2782_v33  ;;  %v1281_v63 = vpop.f32.mrb[61].mxu1 }
 0x2d7   : > { %v1282_v25 = vadd.f32 %v2782_v33, %v1281_v63  ;;  %v2204_v3 = vpop.f32.mrb[62].mxu1  ;;  %v524_v63 = vadd.f32 %v2573_v54, %v2509_v61  ;;  %v528_v54 = vadd.f32 %v2576_v55, %v2509_v61  ;;  %v554_v55 = vadd.f32 %v2600_v28, %v2509_v61 }
 0x2d8   : > { %v1293_v18 = vadd.f32 %v2204_v3, %v2782_v33  ;;  %v1284_v58 = vpop.f32.mrb[63].mxu1  ;;  %v1358_v7 = vmax.f32 %v1290_v34, 0.0  ;;  %v538_v3 = vadd.f32 %v2585_v8, %v2509_v61  ;;  %v548_v28 = vadd.f32 %v2594_v20, %v2509_v61 }
 0x2d9   : > { %v1285_v62 = vadd.f32 %v2782_v33, %v1284_v58  ;;  %v1356_v47 = vmax.f32 %v1282_v25, 0.0  ;;  %v534_v33 = vadd.f32 %v2582_v4, %v2509_v61  ;;  %v574_v20 = vadd.f32 %v2615_v50, %v2509_v61 }
 0x2da   : > { %v1359_v48 = vmax.f32 %v1293_v18, 0.0  ;;  %v568_v50 = vadd.f32 %v2612_v44, %v2509_v61  ;;  %v594_v44 = vadd.f32 %v2627_v10, %v2509_v61  ;;  %v588_v10 = vadd.f32 %v2624_v1, %v2509_v61 }
 0x2db   : > { %v1357_v37 = vmax.f32 %v1285_v62, 0.0  ;;  %v614_v1 = vadd.f32 %v2639_v31, %v2509_v61  ;;  %v608_v31 = vadd.f32 %v2636_v24, %v2509_v61  ;;  %v634_v24 = vadd.f32 %v2651_v57, %v2509_v61 }
 0x2dc   : > { %v1391_v45 = vpack.c.bf16 %v1359_v48, %v1358_v7  ;;  %v628_v57 = vadd.f32 %v2648_v46, %v2509_v61  ;;  %v654_v46 = vadd.f32 %v2666_v22, %v2509_v61  ;;  %v648_v22 = vadd.f32 %v2660_v11, %v2509_v61 }
 0x2dd   : > { %v1390_v49 = vpack.c.bf16 %v1357_v37, %v1356_v47  ;;  %v2223_v27 = vpop.f32.mrb[64].mxu1  ;;  %v674_v11 = vadd.f32 %v2690_v59, %v2509_v61  ;;  %v668_v59 = vadd.f32 %v2681_v43, %v2509_v61  ;;  %v694_v43 = vadd.f32 %v2711_v36, %v2509_v61 }
 0x2de   : > { %v1506_v51 = vadd.f32 %v2223_v27, %v2872_v15  ;;  %v1497_v5 = vpop.f32.mrb[65].mxu1  ;;  %v688_v36 = vadd.f32 %v2705_v23, %v2509_v61  ;;  %v714_v23 = vadd.f32 %v2723_v14, %v2509_v61 }
 0x2df   : > { %v1498_v39 = vadd.f32 %v2872_v15, %v1497_v5  ;;  %v2224_v9 = vpop.f32.mrb[66].mxu1  ;;  %2281 = vmatprep.mubr.bf16.mxu1 %v1390_v49 }
 0x2e0   : > { %v1754_v30 = vmax.f32 %v1506_v51, 0.0  ;;  %v1509_v2 = vadd.f32 %v2224_v9, %v2872_v15  ;;  %v1500_v34 = vpop.f32.mrb[67].mxu1  ;;  %2282 = vmatmul.mubr.bf16.gmra.mrb[124].mxu1 %v1391_v45  ;;  %v544_v9 = vadd.f32 %v2591_v16, %v2509_v61 }
 0x2e1   : > { %v1752_v25 = vmax.f32 %v1498_v39, 0.0  ;;  %v1501_v4 = vadd.f32 %v2872_v15, %v1500_v34 }
 0x2e2   : > { %v1818_v18 = vadd.f32 %v1754_v30, %v534_v33  ;;  %v1755_v58 = vmax.f32 %v1509_v2, 0.0  ;;  %v558_v2 = vadd.f32 %v2603_v32, %v2509_v61 }
 0x2e3   : > { %v1816_v62 = vadd.f32 %v1752_v25, %v524_v63  ;;  %v1753_v7 = vmax.f32 %v1501_v4, 0.0 }
 0x2e4   : > { %1882 = vst [vmem:[%s2886_s19 + $0x10] sm:$0xff] %v1818_v18  ;;  %v1819_v48 = vadd.f32 %v1755_v58, %v538_v3 }
 0x2e5   : > { %1880 = vst [vmem:[%s2886_s19] sm:$0xff] %v1816_v62  ;;  %v1817_v47 = vadd.f32 %v1753_v7, %v528_v54  ;;  %v2227_v37 = vpop.f32.mrb[68].mxu1 }
 0x2e6   : > { %1883 = vst [vmem:[%s2886_s19 + $0x18] sm:$0xff] %v1819_v48  ;;  %v1522_v45 = vadd.f32 %v2227_v37, %v2872_v15  ;;  %v1513_v49 = vpop.f32.mrb[69].mxu1  ;;  %v564_v37 = vadd.f32 %v2609_v40, %v2509_v61 }
 0x2e7   : > { %1881 = vst [vmem:[%s2886_s19 + $0x8] sm:$0xff] %v1817_v47  ;;  %v1514_v8 = vadd.f32 %v2872_v15, %v1513_v49  ;;  %v2228_v27 = vpop.f32.mrb[70].mxu1 }
 0x2e8   : > { %v1758_v51 = vmax.f32 %v1522_v45, 0.0  ;;  %v1525_v5 = vadd.f32 %v2228_v27, %v2872_v15  ;;  %v1516_v39 = vpop.f32.mrb[71].mxu1 }
 0x2e9   : > { %v1756_v33 = vmax.f32 %v1514_v8, 0.0  ;;  %v1517_v30 = vadd.f32 %v2872_v15, %v1516_v39  ;;  %v578_v8 = vadd.f32 %v2618_v53, %v2509_v61 }
 0x2ea   : > { %v1822_v34 = vadd.f32 %v1758_v51, %v554_v55  ;;  %v1759_v63 = vmax.f32 %v1525_v5, 0.0 }
 0x2eb   : > { %v1820_v25 = vadd.f32 %v1756_v33, %v544_v9  ;;  %v1757_v4 = vmax.f32 %v1517_v30, 0.0 }
 0x2ec   : > { %1886 = vst [vmem:[%s2886_s19 + $0x30] sm:$0xff] %v1822_v34  ;;  %v1823_v3 = vadd.f32 %v1759_v63, %v558_v2 }
 0x2ed   : > { %1884 = vst [vmem:[%s2886_s19 + $0x20] sm:$0xff] %v1820_v25  ;;  %v1821_v18 = vadd.f32 %v1757_v4, %v548_v28  ;;  %v2231_v58 = vpop.f32.mrb[72].mxu1  ;;  %v584_v25 = vadd.f32 %v2621_v56, %v2509_v61 }
 0x2ee   : > { %1887 = vst [vmem:[%s2886_s19 + $0x38] sm:$0xff] %v1823_v3  ;;  %v1538_v16 = vadd.f32 %v2231_v58, %v2872_v15  ;;  %v1529_v54 = vpop.f32.mrb[73].mxu1 }
 0x2ef   : > { %1885 = vst [vmem:[%s2886_s19 + $0x28] sm:$0xff] %v1821_v18  ;;  %v1530_v32 = vadd.f32 %v2872_v15, %v1529_v54  ;;  %v2232_v62 = vpop.f32.mrb[74].mxu1  ;;  %v598_v18 = vadd.f32 %v2630_v13, %v2509_v61 }
 0x2f0   : > { %v1762_v7 = vmax.f32 %v1538_v16, 0.0  ;;  %v1541_v48 = vadd.f32 %v2232_v62, %v2872_v15  ;;  %v1532_v47 = vpop.f32.mrb[75].mxu1 }
 0x2f1   : > { %v1760_v45 = vmax.f32 %v1530_v32, 0.0  ;;  %v1533_v49 = vadd.f32 %v2872_v15, %v1532_v47 }
 0x2f2   : > { %v1826_v27 = vadd.f32 %v1762_v7, %v574_v20  ;;  %v1763_v55 = vmax.f32 %v1541_v48, 0.0 }
 0x2f3   : > { %v1824_v51 = vadd.f32 %v1760_v45, %v564_v37  ;;  %v1761_v5 = vmax.f32 %v1533_v49, 0.0 }
 0x2f4   : > { %1890 = vst [vmem:[%s2886_s19 + $0x50] sm:$0xff] %v1826_v27  ;;  %v1827_v39 = vadd.f32 %v1763_v55, %v578_v8  ;;  %v604_v8 = vadd.f32 %v2633_v21, %v2509_v61 }
 0x2f5   : > { %1888 = vst [vmem:[%s2886_s19 + $0x40] sm:$0xff] %v1824_v51  ;;  %v1825_v9 = vadd.f32 %v1761_v5, %v568_v50  ;;  %v2235_v33 = vpop.f32.mrb[76].mxu1  ;;  %v618_v50 = vadd.f32 %v2642_v35, %v2509_v61 }
 0x2f6   : > { %1891 = vst [vmem:[%s2886_s19 + $0x58] sm:$0xff] %v1827_v39  ;;  %v1554_v40 = vadd.f32 %v2235_v33, %v2872_v15  ;;  %v1545_v30 = vpop.f32.mrb[77].mxu1 }
 0x2f7   : > { %1889 = vst [vmem:[%s2886_s19 + $0x48] sm:$0xff] %v1825_v9  ;;  %v1546_v53 = vadd.f32 %v2872_v15, %v1545_v30  ;;  %v2236_v2 = vpop.f32.mrb[78].mxu1 }
 0x2f8   : > { %v1766_v34 = vmax.f32 %v1554_v40, 0.0  ;;  %v1557_v63 = vadd.f32 %v2236_v2, %v2872_v15  ;;  %v1548_v28 = vpop.f32.mrb[79].mxu1 }
 0x2f9   : > { %v1764_v4 = vmax.f32 %v1546_v53, 0.0  ;;  %v1549_v3 = vadd.f32 %v2872_v15, %v1548_v28  ;;  %v624_v28 = vadd.f32 %v2645_v42, %v2509_v61 }
 0x2fa   : > { %v1830_v58 = vadd.f32 %v1766_v34, %v594_v44  ;;  %v1767_v16 = vmax.f32 %v1557_v63, 0.0 }
 0x2fb   : > { %v1828_v54 = vadd.f32 %v1764_v4, %v584_v25  ;;  %v1765_v32 = vmax.f32 %v1549_v3, 0.0  ;;  %v638_v3 = vadd.f32 %v2654_v60, %v2509_v61 }
 0x2fc   : > { %1894 = vst [vmem:[%s2886_s19 + $0x70] sm:$0xff] %v1830_v58  ;;  %v1831_v62 = vadd.f32 %v1767_v16, %v598_v18 }
 0x2fd   : > { %1892 = vst [vmem:[%s2886_s19 + $0x60] sm:$0xff] %v1828_v54  ;;  %v1829_v20 = vadd.f32 %v1765_v32, %v588_v10 }
 0x2fe   : > { %1895 = vst [vmem:[%s2886_s19 + $0x78] sm:$0xff] %v1831_v62 }
 0x2ff   : > { %1893 = vst [vmem:[%s2886_s19 + $0x68] sm:$0xff] %v1829_v20 }
 0x303   : > { %v2239_v56 = vpop.f32.mrb[80].mxu1 }
 0x304   : > { %v1570_v7 = vadd.f32 %v2239_v56, %v2872_v15  ;;  %v1561_v48 = vpop.f32.mrb[81].mxu1 }
 0x305   : > { %v1562_v13 = vadd.f32 %v2872_v15, %v1561_v48  ;;  %v2240_v47 = vpop.f32.mrb[82].mxu1 }
 0x306   : > { %v1770_v37 = vmax.f32 %v1570_v7, 0.0  ;;  %v1573_v45 = vadd.f32 %v2240_v47, %v2872_v15  ;;  %v1564_v49 = vpop.f32.mrb[83].mxu1  ;;  %v644_v47 = vadd.f32 %v2657_v6, %v2509_v61 }
 0x307   : > { %v1768_v27 = vmax.f32 %v1562_v13, 0.0  ;;  %v1565_v55 = vadd.f32 %v2872_v15, %v1564_v49 }
 0x308   : > { %v1834_v51 = vadd.f32 %v1770_v37, %v614_v1  ;;  %v1771_v5 = vmax.f32 %v1573_v45, 0.0  ;;  %v658_v45 = vadd.f32 %v2669_v26, %v2509_v61 }
 0x309   : > { %v1832_v39 = vadd.f32 %v1768_v27, %v604_v8  ;;  %v1769_v9 = vmax.f32 %v1565_v55, 0.0 }
 0x30a   : > { %1898 = vst [vmem:[%s2886_s19 + $0x90] sm:$0xff] %v1834_v51  ;;  %v1835_v33 = vadd.f32 %v1771_v5, %v618_v50 }
 0x30b   : > { %1896 = vst [vmem:[%s2886_s19 + $0x80] sm:$0xff] %v1832_v39  ;;  %v1833_v40 = vadd.f32 %v1769_v9, %v608_v31 }
 0x30c   : > { %1899 = vst [vmem:[%s2886_s19 + $0x98] sm:$0xff] %v1835_v33 }
 0x30d   : > { %1897 = vst [vmem:[%s2886_s19 + $0x88] sm:$0xff] %v1833_v40 }
 0x313   : > { %v2243_v21 = vpop.f32.mrb[84].mxu1 }
 0x314   : > { %v1586_v30 = vadd.f32 %v2243_v21, %v2872_v15  ;;  %v1577_v53 = vpop.f32.mrb[85].mxu1  ;;  %v664_v21 = vadd.f32 %v2678_v38, %v2509_v61 }
 0x315   : > { %v1578_v35 = vadd.f32 %v2872_v15, %v1577_v53  ;;  %v2244_v2 = vpop.f32.mrb[86].mxu1 }
 0x316   : > { %v1774_v44 = vmax.f32 %v1586_v30, 0.0  ;;  %v1589_v34 = vadd.f32 %v2244_v2, %v2872_v15  ;;  %v1580_v63 = vpop.f32.mrb[87].mxu1 }
 0x317   : > { %v1772_v25 = vmax.f32 %v1578_v35, 0.0  ;;  %v1581_v4 = vadd.f32 %v2872_v15, %v1580_v63  ;;  %v678_v35 = vadd.f32 %v2693_v0, %v2509_v61 }
 0x318   : > { %v1838_v18 = vadd.f32 %v1774_v44, %v634_v24  ;;  %v1775_v58 = vmax.f32 %v1589_v34, 0.0 }
 0x319   : > { %v1836_v16 = vadd.f32 %v1772_v25, %v624_v28  ;;  %v1773_v10 = vmax.f32 %v1581_v4, 0.0 }
 0x31a   : > { %1902 = vst [vmem:[%s2886_s19 + $0xb0] sm:$0xff] %v1838_v18  ;;  %v1839_v54 = vadd.f32 %v1775_v58, %v638_v3 }
 0x31b   : > { %1900 = vst [vmem:[%s2886_s19 + $0xa0] sm:$0xff] %v1836_v16  ;;  %v1837_v32 = vadd.f32 %v1773_v10, %v628_v57  ;;  %v684_v16 = vadd.f32 %v2702_v17, %v2509_v61 }
 0x31c   : > { %1903 = vst [vmem:[%s2886_s19 + $0xb8] sm:$0xff] %v1839_v54 }
 0x31d   : > { %1901 = vst [vmem:[%s2886_s19 + $0xa8] sm:$0xff] %v1837_v32  ;;  %v698_v32 = vadd.f32 %v2714_v41, %v2509_v61 }
 0x323   : > { %v2247_v42 = vpop.f32.mrb[88].mxu1 }
 0x324   : > { %v1602_v62 = vadd.f32 %v2247_v42, %v2872_v15  ;;  %v1593_v20 = vpop.f32.mrb[89].mxu1 }
 0x325   : > { %v1594_v60 = vadd.f32 %v2872_v15, %v1593_v20  ;;  %v2248_v56 = vpop.f32.mrb[90].mxu1 }
 0x326   : > { %v1778_v7 = vmax.f32 %v1602_v62, 0.0  ;;  %v1605_v48 = vadd.f32 %v2248_v56, %v2872_v15  ;;  %v1596_v13 = vpop.f32.mrb[91].mxu1 }
 0x327   : > { %v1776_v1 = vmax.f32 %v1594_v60, 0.0  ;;  %v1597_v37 = vadd.f32 %v2872_v15, %v1596_v13 }
 0x328   : > { %v1842_v49 = vadd.f32 %v1778_v7, %v654_v46  ;;  %v1779_v8 = vmax.f32 %v1605_v48, 0.0 }
 0x329   : > { %v1840_v27 = vadd.f32 %v1776_v1, %v644_v47  ;;  %v1777_v55 = vmax.f32 %v1597_v37, 0.0 }
 0x32a   : > { %1906 = vst [vmem:[%s2886_s19 + $0xd0] sm:$0xff] %v1842_v49  ;;  %v1843_v50 = vadd.f32 %v1779_v8, %v658_v45  ;;  %v704_v45 = vadd.f32 %v2717_v52, %v2509_v61 }
 0x32b   : > { %1904 = vst [vmem:[%s2886_s19 + $0xc0] sm:$0xff] %v1840_v27  ;;  %v1841_v51 = vadd.f32 %v1777_v55, %v648_v22  ;;  %v718_v22 = vadd.f32 %v2726_v19, %v2509_v61 }
 0x32c   : > { %1907 = vst [vmem:[%s2886_s19 + $0xd8] sm:$0xff] %v1843_v50  ;;  %v3171_v50 = vld [vmem:[#allocation2_spill] sm:$0xff] }
 0x32d   : > { %1905 = vst [vmem:[%s2886_s19 + $0xc8] sm:$0xff] %v1841_v51  ;;  %v708_v14 = vadd.f32 %v3171_v50, %v2509_v61 }
 0x333   : > { %v2251_v6 = vpop.f32.mrb[92].mxu1 }
 0x334   : > { %v1618_v5 = vadd.f32 %v2251_v6, %v2872_v15  ;;  %v1609_v31 = vpop.f32.mrb[93].mxu1 }
 0x335   : > { %v1610_v26 = vadd.f32 %v2872_v15, %v1609_v31  ;;  %v2252_v39 = vpop.f32.mrb[94].mxu1 }
 0x336   : > { %v1782_v9 = vmax.f32 %v1618_v5, 0.0  ;;  %v1621_v33 = vadd.f32 %v2252_v39, %v2872_v15  ;;  %v1612_v40 = vpop.f32.mrb[95].mxu1 }
 0x337   : > { %v1780_v30 = vmax.f32 %v1610_v26, 0.0  ;;  %v1613_v53 = vadd.f32 %v2872_v15, %v1612_v40 }
 0x338   : > { %v1846_v2 = vadd.f32 %v1782_v9, %v674_v11  ;;  %v1783_v24 = vmax.f32 %v1621_v33, 0.0  ;;  %v3172_v9 = vld [vmem:[#allocation5_spill] sm:$0xff] }
 0x339   : > { %v1844_v44 = vadd.f32 %v1780_v30, %v664_v21  ;;  %v1781_v34 = vmax.f32 %v1613_v53, 0.0  ;;  %v734_v33 = vadd.f32 %v3172_v9, %v2509_v61  ;;  %v3173_v53 = vld [vmem:[#allocation3_spill] sm:$0xff] }
 0x33a   : > { %1910 = vst [vmem:[%s2886_s19 + $0xf0] sm:$0xff] %v1846_v2  ;;  %v1847_v63 = vadd.f32 %v1783_v24, %v678_v35  ;;  %v724_v35 = vadd.f32 %v3173_v53, %v2509_v61 }
 0x33b   : > { %1908 = vst [vmem:[%s2886_s19 + $0xe0] sm:$0xff] %v1844_v44  ;;  %v1845_v28 = vadd.f32 %v1781_v34, %v668_v59  ;;  %v3174_v59 = vld [vmem:[#allocation6_spill] sm:$0xff] }
 0x33c   : > { %1911 = vst [vmem:[%s2886_s19 + $0xf8] sm:$0xff] %v1847_v63  ;;  %v738_v44 = vadd.f32 %v3174_v59, %v2509_v61 }
 0x33d   : > { %1909 = vst [vmem:[%s2886_s19 + $0xe8] sm:$0xff] %v1845_v28  ;;  %v3175_v28 = vld [vmem:[#allocation4_spill] sm:$0xff] }
 0x343   : > { %v2255_v38 = vpop.f32.mrb[96].mxu1 }
 0x344   : > { %v1634_v25 = vadd.f32 %v2255_v38, %v2872_v15  ;;  %v1625_v4 = vpop.f32.mrb[97].mxu1  ;;  %v728_v38 = vadd.f32 %v3175_v28, %v2509_v61 }
 0x345   : > { %v1626_v0 = vadd.f32 %v2872_v15, %v1625_v4  ;;  %v2256_v3 = vpop.f32.mrb[98].mxu1 }
 0x346   : > { %v1786_v18 = vmax.f32 %v1634_v25, 0.0  ;;  %v1637_v58 = vadd.f32 %v2256_v3, %v2872_v15  ;;  %v1628_v57 = vpop.f32.mrb[99].mxu1 }
 0x347   : > { %v1784_v10 = vmax.f32 %v1626_v0, 0.0  ;;  %v1629_v54 = vadd.f32 %v2872_v15, %v1628_v57 }
 0x348   : > { %v1850_v42 = vadd.f32 %v1786_v18, %v694_v43  ;;  %v1787_v62 = vmax.f32 %v1637_v58, 0.0 }
 0x349   : > { %v1848_v20 = vadd.f32 %v1784_v10, %v684_v16  ;;  %v1785_v60 = vmax.f32 %v1629_v54, 0.0  ;;  %v3176_v10 = vld [vmem:[#allocation9_spill] sm:$0xff] }
 0x34a   : > { %1914 = vst [vmem:[%s2886_s19 + $0x110] sm:$0xff] %v1850_v42  ;;  %v1851_v56 = vadd.f32 %v1787_v62, %v698_v32  ;;  %v754_v54 = vadd.f32 %v3176_v10, %v2509_v61 }
 0x34b   : > { %1912 = vst [vmem:[%s2886_s19 + $0x100] sm:$0xff] %v1848_v20  ;;  %v1849_v46 = vadd.f32 %v1785_v60, %v688_v36  ;;  %v3177_v36 = vld [vmem:[#allocation7_spill] sm:$0xff] }
 0x34c   : > { %1915 = vst [vmem:[%s2886_s19 + $0x118] sm:$0xff] %v1851_v56  ;;  %v744_v20 = vadd.f32 %v3177_v36, %v2509_v61 }
 0x34d   : > { %1913 = vst [vmem:[%s2886_s19 + $0x108] sm:$0xff] %v1849_v46  ;;  %v3178_v46 = vld [vmem:[#allocation10_spill] sm:$0xff] }
 0x353   : > { %v2259_v17 = vpop.f32.mrb[100].mxu1 }
 0x354   : > { %v1650_v7 = vadd.f32 %v2259_v17, %v2872_v15  ;;  %v1641_v48 = vpop.f32.mrb[101].mxu1  ;;  %v758_v17 = vadd.f32 %v3178_v46, %v2509_v61 }
 0x355   : > { %v1642_v41 = vadd.f32 %v2872_v15, %v1641_v48  ;;  %v2260_v13 = vpop.f32.mrb[102].mxu1 }
 0x356   : > { %v1790_v47 = vmax.f32 %v1650_v7, 0.0  ;;  %v1653_v1 = vadd.f32 %v2260_v13, %v2872_v15  ;;  %v1644_v37 = vpop.f32.mrb[103].mxu1 }
 0x357   : > { %v1788_v49 = vmax.f32 %v1642_v41, 0.0  ;;  %v1645_v8 = vadd.f32 %v2872_v15, %v1644_v37  ;;  %v3179_v41 = vld [vmem:[#allocation8_spill] sm:$0xff] }
 0x358   : > { %v1854_v27 = vadd.f32 %v1790_v47, %v714_v23  ;;  %v1791_v55 = vmax.f32 %v1653_v1, 0.0  ;;  %v748_v13 = vadd.f32 %v3179_v41, %v2509_v61 }
 0x359   : > { %v1852_v51 = vadd.f32 %v1788_v49, %v704_v45  ;;  %v1789_v6 = vmax.f32 %v1645_v8, 0.0 }
 0x35a   : > { %1918 = vst [vmem:[%s2886_s19 + $0x130] sm:$0xff] %v1854_v27  ;;  %v1855_v5 = vadd.f32 %v1791_v55, %v718_v22  ;;  %v3180_v55 = vld [vmem:[#allocation13_spill] sm:$0xff] }
 0x35b   : > { %1916 = vst [vmem:[%s2886_s19 + $0x120] sm:$0xff] %v1852_v51  ;;  %v1853_v31 = vadd.f32 %v1789_v6, %v708_v14  ;;  %v774_v50 = vadd.f32 %v3180_v55, %v2509_v61 }
 0x35c   : > { %1919 = vst [vmem:[%s2886_s19 + $0x138] sm:$0xff] %v1855_v5  ;;  %v3181_v5 = vld [vmem:[#allocation11_spill] sm:$0xff] }
 0x35d   : > { %1917 = vst [vmem:[%s2886_s19 + $0x128] sm:$0xff] %v1853_v31  ;;  %v764_v31 = vadd.f32 %v3181_v5, %v2509_v61 }
 0x363   : > { %v2263_v52 = vpop.f32.mrb[104].mxu1 }
 0x364   : > { %v1666_v26 = vadd.f32 %v2263_v52, %v2872_v15  ;;  %v1657_v39 = vpop.f32.mrb[105].mxu1 }
 0x365   : > { %v1658_v19 = vadd.f32 %v2872_v15, %v1657_v39  ;;  %v2264_v11 = vpop.f32.mrb[106].mxu1  ;;  %v3182_v39 = vld [vmem:[#allocation14_spill] sm:$0xff] }
 0x366   : > { %v1794_v40 = vmax.f32 %v1666_v26, 0.0  ;;  %v1669_v21 = vadd.f32 %v2264_v11, %v2872_v15  ;;  %v1660_v30 = vpop.f32.mrb[107].mxu1 }
 0x367   : > { %v1792_v2 = vmax.f32 %v1658_v19, 0.0  ;;  %v1661_v24 = vadd.f32 %v2872_v15, %v1660_v30  ;;  %v778_v19 = vadd.f32 %v3182_v39, %v2509_v61 }
 0x368   : > { %v1858_v34 = vadd.f32 %v1794_v40, %v734_v33  ;;  %v1795_v63 = vmax.f32 %v1669_v21, 0.0  ;;  %v3183_v33 = vld [vmem:[#allocation12_spill] sm:$0xff] }
 0x369   : > { %v1856_v25 = vadd.f32 %v1792_v2, %v724_v35  ;;  %v1793_v4 = vmax.f32 %v1661_v24, 0.0  ;;  %v768_v40 = vadd.f32 %v3183_v33, %v2509_v61 }
 0x36a   : > { %1922 = vst [vmem:[%s2886_s19 + $0x150] sm:$0xff] %v1858_v34  ;;  %v1859_v0 = vadd.f32 %v1795_v63, %v738_v44  ;;  %v3184_v63 = vld [vmem:[#allocation17_spill] sm:$0xff] }
 0x36b   : > { %1920 = vst [vmem:[%s2886_s19 + $0x140] sm:$0xff] %v1856_v25  ;;  %v1857_v3 = vadd.f32 %v1793_v4, %v728_v38  ;;  %v794_v28 = vadd.f32 %v3184_v63, %v2509_v61 }
 0x36c   : > { %1923 = vst [vmem:[%s2886_s19 + $0x158] sm:$0xff] %v1859_v0  ;;  %v3185_v0 = vld [vmem:[#allocation15_spill] sm:$0xff] }
 0x36d   : > { %1921 = vst [vmem:[%s2886_s19 + $0x148] sm:$0xff] %v1857_v3  ;;  %v784_v3 = vadd.f32 %v3185_v0, %v2509_v61 }
 0x373   : > { %v2267_v43 = vpop.f32.mrb[108].mxu1 }
 0x374   : > { %v1682_v18 = vadd.f32 %v2267_v43, %v2872_v15  ;;  %v1673_v58 = vpop.f32.mrb[109].mxu1 }
 0x375   : > { %v1674_v57 = vadd.f32 %v2872_v15, %v1673_v58  ;;  %v2268_v16 = vpop.f32.mrb[110].mxu1  ;;  %v3186_v58 = vld [vmem:[#allocation18_spill] sm:$0xff] }
 0x376   : > { %v1798_v32 = vmax.f32 %v1682_v18, 0.0  ;;  %v1685_v42 = vadd.f32 %v2268_v16, %v2872_v15  ;;  %v1676_v62 = vpop.f32.mrb[111].mxu1 }
 0x377   : > { %v1796_v60 = vmax.f32 %v1674_v57, 0.0  ;;  %v1677_v56 = vadd.f32 %v2872_v15, %v1676_v62  ;;  %v798_v57 = vadd.f32 %v3186_v58, %v2509_v61 }
 0x378   : > { %v1862_v7 = vadd.f32 %v1798_v32, %v754_v54  ;;  %v1799_v48 = vmax.f32 %v1685_v42, 0.0  ;;  %v3187_v54 = vld [vmem:[#allocation16_spill] sm:$0xff] }
 0x379   : > { %v1860_v23 = vadd.f32 %v1796_v60, %v744_v20  ;;  %v1797_v47 = vmax.f32 %v1677_v56, 0.0  ;;  %v788_v32 = vadd.f32 %v3187_v54, %v2509_v61 }
 0x37a   : > { %1926 = vst [vmem:[%s2886_s19 + $0x170] sm:$0xff] %v1862_v7  ;;  %v1863_v1 = vadd.f32 %v1799_v48, %v758_v17  ;;  %v3188_v48 = vld [vmem:[#allocation21_spill] sm:$0xff] }
 0x37b   : > { %1924 = vst [vmem:[%s2886_s19 + $0x160] sm:$0xff] %v1860_v23  ;;  %v1861_v37 = vadd.f32 %v1797_v47, %v748_v13  ;;  %v814_v41 = vadd.f32 %v3188_v48, %v2509_v61 }
 0x37c   : > { %1927 = vst [vmem:[%s2886_s19 + $0x178] sm:$0xff] %v1863_v1  ;;  %v3189_v1 = vld [vmem:[#allocation19_spill] sm:$0xff] }
 0x37d   : > { %1925 = vst [vmem:[%s2886_s19 + $0x168] sm:$0xff] %v1861_v37  ;;  %v804_v37 = vadd.f32 %v3189_v1, %v2509_v61 }
 0x383   : > { %v2271_v45 = vpop.f32.mrb[112].mxu1 }
 0x384   : > { %v1698_v49 = vadd.f32 %v2271_v45, %v2872_v15  ;;  %v1689_v8 = vpop.f32.mrb[113].mxu1 }
 0x385   : > { %v1690_v22 = vadd.f32 %v2872_v15, %v1689_v8  ;;  %v2272_v27 = vpop.f32.mrb[114].mxu1  ;;  %v3190_v8 = vld [vmem:[#allocation22_spill] sm:$0xff] }
 0x386   : > { %v1802_v14 = vmax.f32 %v1698_v49, 0.0  ;;  %v1701_v51 = vadd.f32 %v2272_v27, %v2872_v15  ;;  %v1692_v6 = vpop.f32.mrb[115].mxu1 }
 0x387   : > { %v1800_v52 = vmax.f32 %v1690_v22, 0.0  ;;  %v1693_v26 = vadd.f32 %v2872_v15, %v1692_v6  ;;  %v818_v22 = vadd.f32 %v3190_v8, %v2509_v61 }
 0x388   : > { %v1866_v11 = vadd.f32 %v1802_v14, %v774_v50  ;;  %v1803_v9 = vmax.f32 %v1701_v51, 0.0  ;;  %v3191_v50 = vld [vmem:[#allocation20_spill] sm:$0xff] }
 0x389   : > { %v1864_v21 = vadd.f32 %v1800_v52, %v764_v31  ;;  %v1801_v30 = vmax.f32 %v1693_v26, 0.0  ;;  %v808_v14 = vadd.f32 %v3191_v50, %v2509_v61 }
 0x38a   : > { %1930 = vst [vmem:[%s2886_s19 + $0x190] sm:$0xff] %v1866_v11  ;;  %v1867_v53 = vadd.f32 %v1803_v9, %v778_v19  ;;  %v834_v9 = vadd.f32 %v2808_v12, %v2509_v61 }
 0x38b   : > { %1928 = vst [vmem:[%s2886_s19 + $0x180] sm:$0xff] %v1864_v21  ;;  %v1865_v35 = vadd.f32 %v1801_v30, %v768_v40  ;;  %v3192_v30 = vld [vmem:[#allocation23_spill] sm:$0xff] }
 0x38c   : > { %1931 = vst [vmem:[%s2886_s19 + $0x198] sm:$0xff] %v1867_v53  ;;  %v824_v53 = vadd.f32 %v3192_v30, %v2509_v61 }
 0x38d   : > { %1929 = vst [vmem:[%s2886_s19 + $0x188] sm:$0xff] %v1865_v35 }
 0x393   : > { %v2275_v2 = vpop.f32.mrb[116].mxu1 }
 0x394   : > { %v1714_v24 = vadd.f32 %v2275_v2, %v2872_v15  ;;  %v1705_v59 = vpop.f32.mrb[117].mxu1 }
 0x395   : > { %v1706_v44 = vadd.f32 %v2872_v15, %v1705_v59  ;;  %v2276_v34 = vpop.f32.mrb[118].mxu1 }
 0x396   : > { %v1806_v38 = vmax.f32 %v1714_v24, 0.0  ;;  %v1717_v25 = vadd.f32 %v2276_v34, %v2872_v15  ;;  %v1708_v4 = vpop.f32.mrb[119].mxu1  ;;  %v838_v24 = vadd.f32 %v2811_v29, %v2509_v61  ;;  %v3193_v34 = vld [vmem:[#allocation24_spill] sm:$0xff] }
 0x397   : > { %v1804_v43 = vmax.f32 %v1706_v44, 0.0  ;;  %v1709_v18 = vadd.f32 %v2872_v15, %v1708_v4  ;;  %v828_v12 = vadd.f32 %v3193_v34, %v2509_v61 }
 0x398   : > { %v1870_v16 = vadd.f32 %v1806_v38, %v794_v28  ;;  %v1807_v10 = vmax.f32 %v1717_v25, 0.0 }
 0x399   : > { %v1868_v42 = vadd.f32 %v1804_v43, %v784_v3  ;;  %v1805_v62 = vmax.f32 %v1709_v18, 0.0 }
 0x39a   : > { %1934 = vst [vmem:[%s2886_s19 + $0x1b0] sm:$0xff] %v1870_v16  ;;  %v1871_v36 = vadd.f32 %v1807_v10, %v798_v57 }
 0x39b   : > { %1932 = vst [vmem:[%s2886_s19 + $0x1a0] sm:$0xff] %v1868_v42  ;;  %v1869_v20 = vadd.f32 %v1805_v62, %v788_v32 }
 0x39c   : > { %1935 = vst [vmem:[%s2886_s19 + $0x1b8] sm:$0xff] %v1871_v36 }
 0x39d   : > { %1933 = vst [vmem:[%s2886_s19 + $0x1a8] sm:$0xff] %v1869_v20 }
 0x3a3   : > { %v2279_v60 = vpop.f32.mrb[120].mxu1 }
 0x3a4   : > { %v1730_v56 = vadd.f32 %v2279_v60, %v2872_v15  ;;  %v1721_v46 = vpop.f32.mrb[121].mxu1 }
 0x3a5   : > { %v1722_v17 = vadd.f32 %v2872_v15, %v1721_v46  ;;  %v2280_v7 = vpop.f32.mrb[122].mxu1 }
 0x3a6   : > { %v1810_v13 = vmax.f32 %v1730_v56, 0.0  ;;  %v1733_v23 = vadd.f32 %v2280_v7, %v2872_v15  ;;  %v1724_v47 = vpop.f32.mrb[123].mxu1 }
 0x3a7   : > { %v1808_v45 = vmax.f32 %v1722_v17, 0.0  ;;  %v1725_v49 = vadd.f32 %v2872_v15, %v1724_v47 }
 0x3a8   : > { %v1874_v27 = vadd.f32 %v1810_v13, %v814_v41  ;;  %v1811_v55 = vmax.f32 %v1733_v23, 0.0 }
 0x3a9   : > { %v1872_v51 = vadd.f32 %v1808_v45, %v804_v37  ;;  %v1809_v6 = vmax.f32 %v1725_v49, 0.0 }
 0x3aa   : > { %1938 = vst [vmem:[%s2886_s19 + $0x1d0] sm:$0xff] %v1874_v27  ;;  %v1875_v5 = vadd.f32 %v1811_v55, %v818_v22 }
 0x3ab   : > { %1936 = vst [vmem:[%s2886_s19 + $0x1c0] sm:$0xff] %v1872_v51  ;;  %v1873_v31 = vadd.f32 %v1809_v6, %v808_v14 }
 0x3ac   : > { %1939 = vst [vmem:[%s2886_s19 + $0x1d8] sm:$0xff] %v1875_v5 }
 0x3ad   : > { %1937 = vst [vmem:[%s2886_s19 + $0x1c8] sm:$0xff] %v1873_v31 }
 0x3b3   : > { %v2283_v52 = vpop.f32.mrb[124].mxu1 }
 0x3b4   : > { %v1746_v26 = vadd.f32 %v2283_v52, %v2872_v15  ;;  %v1737_v39 = vpop.f32.mrb[125].mxu1 }
 0x3b5   : > { %v1738_v19 = vadd.f32 %v2872_v15, %v1737_v39  ;;  %v2284_v11 = vpop.f32.mrb[126].mxu1 }
 0x3b6   : > { %v1814_v33 = vmax.f32 %v1746_v26, 0.0  ;;  %v1749_v40 = vadd.f32 %v2284_v11, %v2872_v15  ;;  %v1740_v21 = vpop.f32.mrb[127].mxu1 }
 0x3b7   : > { %v1812_v35 = vmax.f32 %v1738_v19, 0.0  ;;  %v1741_v2 = vadd.f32 %v2872_v15, %v1740_v21 }
 0x3b8   : > { %v1878_v59 = vadd.f32 %v1814_v33, %v834_v9  ;;  %v1815_v44 = vmax.f32 %v1749_v40, 0.0 }
 0x3b9   : > { %v1876_v63 = vadd.f32 %v1812_v35, %v824_v53  ;;  %v1813_v28 = vmax.f32 %v1741_v2, 0.0 }
 0x3ba   : > { %1942 = vst [vmem:[%s2886_s19 + $0x1f0] sm:$0xff] %v1878_v59  ;;  %v1879_v38 = vadd.f32 %v1815_v44, %v838_v24 }
 0x3bb   : > { %1940 = vst [vmem:[%s2886_s19 + $0x1e0] sm:$0xff] %v1876_v63  ;;  %v1877_v25 = vadd.f32 %v1813_v28, %v828_v12 }
 0x3bc   : > { %1943 = vst [vmem:[%s2886_s19 + $0x1f8] sm:$0xff] %v1879_v38 }
 0x3bd   : > { %1941 = vst [vmem:[%s2886_s19 + $0x1e8] sm:$0xff] %v1877_v25 }
 0x3be PF: > { %s17_s24 = sadd.s32 1, %s2340_s24  }
 0x3bf   : > { %p14_p4 = scmp.ge.s32.totalorder %s17_s24, 4  }
 0x3c1   :  { %16 = sbr.rel (!%p14_p4) target bundleno = 1 (0x1), region = 78 }

</bundles_post_ra>
